<compile_context>
chip_gen: v7x
topology: tpu7x:2x2x1
jax: 0.10.0
libtpu: 0.0.40
codegen_flags: <defaults>
</compile_context>

<pallas_src>
import jax
import jax.numpy as jnp
import numpy as np
from jax.experimental import pallas as pl
from jax.experimental.pallas import tpu as pltpu


# ---------------------------------------------------------------------------
# Kernel A: batched layer-0 input projection (hoisted out of the recurrence),
# time-chunked row grid.
#   gates0[t] = (img[t] * question) @ W_ih0_img + aemb[t] @ W_ih0_act + b0
# ---------------------------------------------------------------------------
def _input_proj_kernel(img_ref, q_ref, aemb_ref,
                       w_img_ref, w_act_ref, b0_ref, gates_ref):
    Tb, Np, Dimg = img_ref.shape
    Da = aemb_ref.shape[-1]
    G = gates_ref.shape[-1]

    # torch.mul(img, question): broadcast the (Np, Dq) question over the time
    # chunk in-register (no HBM duplication).  Multiply in f32, cast operands
    # to bf16 only at the dot boundary (f32 accumulation on the MXU).
    x_mul = (img_ref[...] * q_ref[...][None, :, :]).astype(jnp.bfloat16)
    x_mul = x_mul.reshape(Tb * Np, Dimg)
    x_act = aemb_ref[...].astype(jnp.bfloat16).reshape(Tb * Np, Da)

    g = jnp.dot(x_mul, w_img_ref[...], preferred_element_type=jnp.float32)
    g = g + jnp.dot(x_act, w_act_ref[...], preferred_element_type=jnp.float32)
    g = g + b0_ref[...]                               # add bias in f32 ...
    gates_ref[...] = g.astype(jnp.bfloat16).reshape(Tb, Np, G)  # ... store bf16


# ---------------------------------------------------------------------------
# Kernel B: sequential 2-layer LSTM recurrence, grid=(Tmax,), h/c carried in
# VMEM scratch.  Only h @ W_hh (layer 0) and the fused [h0|h1] @ W1 (layer 1)
# remain in the time loop.  Per-step output is the lane-dense hidden state.
# ---------------------------------------------------------------------------
def _recurrence_kernel(
    lengths_ref,     # (Np, 1)   int32
    gates0_ref,      # (1, Np, 4H) bf16  -- precomputed x_t @ W_ih0 + b0
    w_hh0_ref,       # (H, 4H)  bf16
    w1_ref,          # (2H, 4H) bf16     -- concat([w_ih1, w_hh1], axis=0)
    b1_ref,          # (1, 4H)  f32      -- b_ih_l1 + b_hh_l1
    h1_seq_ref,      # out (1, Np, H) f32 -- masked per-step layer-1 hidden
    h_n_ref,         # out (2, Np, H) f32 (written at last step)
    c_n_ref,         # out (2, Np, H) f32 (written at last step)
    h0_s, c0_s, h1_s, c1_s,   # scratch (Np, H) f32, persist across grid steps
):
    t = pl.program_id(0)
    Np, H = h0_s.shape

    @pl.when(t == 0)
    def _():
        h0_s[...] = jnp.zeros_like(h0_s)
        c0_s[...] = jnp.zeros_like(c0_s)
        h1_s[...] = jnp.zeros_like(h1_s)
        c1_s[...] = jnp.zeros_like(c1_s)

    # pack_padded_sequence semantics: rows with t >= length freeze h/c and
    # emit zero output rows.  Do NOT remove these masks (layer 1 sees h0
    # frozen at its last valid value at padded steps; that is only equivalent
    # to packed semantics because the h1/c1 updates and the emitted row are
    # masked).
    mask = lengths_ref[...] > t                       # (Np, 1) bool

    def cell(gates, c):
        # Gate math kept in f32 (v5e has no bf16 VPU/EUP path).
        i = jax.nn.sigmoid(gates[:, 0 * H:1 * H])
        f = jax.nn.sigmoid(gates[:, 1 * H:2 * H])
        g = jnp.tanh(gates[:, 2 * H:3 * H])
        o = jax.nn.sigmoid(gates[:, 3 * H:4 * H])
        c_new = f * c + i * g
        return o * jnp.tanh(c_new), c_new

    h0 = h0_s[...]
    c0 = c0_s[...]
    h1 = h1_s[...]
    c1 = c1_s[...]

    # --- layer 0: input projection already hoisted; only h @ W_hh left.
    g0 = gates0_ref[0].astype(jnp.float32) + jnp.dot(
        h0.astype(jnp.bfloat16), w_hh0_ref[...],
        preferred_element_type=jnp.float32)
    h0n, c0n = cell(g0, c0)
    h0 = jnp.where(mask, h0n, h0)
    c0 = jnp.where(mask, c0n, c0)

    # --- layer 1: fused K=2H dot ([h0 | h1] @ [W_ih1 ; W_hh1]).
    h01 = jnp.concatenate([h0, h1], axis=-1).astype(jnp.bfloat16)   # (Np, 2H)
    g1 = b1_ref[...] + jnp.dot(h01, w1_ref[...],
                               preferred_element_type=jnp.float32)
    h1n, c1n = cell(g1, c1)
    h1 = jnp.where(mask, h1n, h1)
    c1 = jnp.where(mask, c1n, c1)

    h0_s[...] = h0
    c0_s[...] = c0
    h1_s[...] = h1
    c1_s[...] = c1

    # pad_packed_sequence zero-fills padded steps; lane-dense H=128 store.
    h1_seq_ref[0] = jnp.where(mask, h1, 0.0)

    @pl.when(t == pl.num_programs(0) - 1)
    def _():
        h_n_ref[0] = h0
        h_n_ref[1] = h1
        c_n_ref[0] = c0
        c_n_ref[1] = c1


def _time_block(tmax, np_rows, target_rows=256):
    """Largest divisor of tmax whose row count (tb * np_rows) <= target."""
    tb_max = max(1, target_rows // max(np_rows, 1))
    tb = 1
    for d in range(1, min(tmax, tb_max) + 1):
        if tmax % d == 0:
            tb = d
    return tb


# ---------------------------------------------------------------------------
# Wrapper: embedding gather, batch padding, layout, the two pallas_calls and
# the batched decoder matmul (applied before the layout transpose).
# ---------------------------------------------------------------------------
def nav_rnn_mult_forward(params, img_feats, question_feats, actions_in,
                         action_lengths):
    """img_feats: (N,T,Dimg) f32, question_feats: (N,Dq) f32,
    actions_in: (N,T) int32, action_lengths: python ints, sorted descending
    (pack_padded_sequence default)."""
    N, T, Dimg = img_feats.shape
    Dq = question_feats.shape[1]
    H = params["w_hh0"].shape[0]
    Da = params["action_embed"].shape[1]
    A = params["w_dec"].shape[1]
    G = 4 * H
    Tmax = int(max(action_lengths))           # pad_packed_sequence length
    Np = -(-N // 16) * 16                     # pad batch to bf16 sublane (16)
    Tb = _time_block(Tmax, Np)                # time chunk for Kernel A grid

    # TODO(synk): embedding gather + layout transposes stay in JAX glue.
    aemb = jnp.take(params["action_embed"], actions_in, axis=0)     # (N,T,Da)

    def pad_b(x, axis):
        pads = [(0, 0)] * x.ndim
        pads[axis] = (0, Np - N)
        return jnp.pad(x, pads)

    img_tm = pad_b(jnp.transpose(img_feats[:, :Tmax, :], (1, 0, 2)), 1)  # (Tmax,Np,Dimg)
    aemb_tm = pad_b(jnp.transpose(aemb[:, :Tmax, :], (1, 0, 2)), 1)      # (Tmax,Np,Da)
    q_pad = pad_b(question_feats, 0)                                     # (Np,Dq)
    lengths = pad_b(
        jnp.asarray(action_lengths, jnp.int32).reshape(N, 1), 0)         # (Np,1), pads=0

    bf16 = jnp.bfloat16
    w_img = params["w_ih0_img"].astype(bf16)                             # (Dimg,4H)
    w_act = params["w_ih0_act"].astype(bf16)                             # (Da,4H)
    w_hh0 = params["w_hh0"].astype(bf16)                                 # (H,4H)
    w1 = jnp.concatenate([params["w_ih1"], params["w_hh1"]],
                         axis=0).astype(bf16)                            # (2H,4H)

    def const(shape):
        return pl.BlockSpec(shape, lambda *_: (0,) * len(shape))

    # --- Kernel A: hoisted, batched layer-0 input projection (row grid) ----
    gates0 = pl.pallas_call(
        _input_proj_kernel,
        grid=(Tmax // Tb,),
        in_specs=[pl.BlockSpec((Tb, Np, Dimg), lambda i: (i, 0, 0)),
                  const((Np, Dq)),
                  pl.BlockSpec((Tb, Np, Da), lambda i: (i, 0, 0)),
                  const((Dimg, G)), const((Da, G)), const((1, G))],
        out_specs=pl.BlockSpec((Tb, Np, G), lambda i: (i, 0, 0)),
        out_shape=jax.ShapeDtypeStruct((Tmax, Np, G), jnp.bfloat16),
        compiler_params=pltpu.CompilerParams(
            dimension_semantics=("parallel",)),
    )(img_tm, q_pad, aemb_tm, w_img, w_act, params["b0"])

    # --- Kernel B: sequential recurrence over a time grid ------------------
    h1_seq, h_n, c_n = pl.pallas_call(
        _recurrence_kernel,
        grid=(Tmax,),
        in_specs=[const((Np, 1)),
                  pl.BlockSpec((1, Np, G), lambda t: (t, 0, 0)),
                  const((H, G)), const((2 * H, G)), const((1, G))],
        out_specs=[pl.BlockSpec((1, Np, H), lambda t: (t, 0, 0)),
                   const((2, Np, H)), const((2, Np, H))],
        out_shape=[jax.ShapeDtypeStruct((Tmax, Np, H), jnp.float32),
                   jax.ShapeDtypeStruct((2, Np, H), jnp.float32),
                   jax.ShapeDtypeStruct((2, Np, H), jnp.float32)],
        scratch_shapes=[pltpu.VMEM((Np, H), jnp.float32)] * 4,
        compiler_params=pltpu.CompilerParams(
            dimension_semantics=("arbitrary",)),
    )(lengths, gates0, w_hh0, w1, params["b1"])

    # --- Decoder before the transpose: the layout copy then moves A=4-wide
    # logits instead of H=128-wide hidden states.
    logits_tm = h1_seq.reshape(Tmax * Np, H) @ params["w_dec"] + params["b_dec"]
    logits_tm = logits_tm.reshape(Tmax, Np, A)[:, :N, :]
    output = jnp.transpose(logits_tm, (1, 0, 2)).reshape(N * Tmax, A)

    return output, (h_n[:, :N, :], c_n[:, :N, :])


# ---------------------------------------------------------------------------
# Deterministic parameter init (shapes exactly as nn.LSTM / nn.Linear / nn.Embedding)
# ---------------------------------------------------------------------------
def init_params(key, image_feat_dim=128, question_embed_dim=128,
                action_embed_dim=32, num_actions=4, hidden_dim=128):
    del question_embed_dim  # must equal image_feat_dim for torch.mul
    H = hidden_dim
    Din = image_feat_dim + action_embed_dim
    k_lstm = 1.0 / np.sqrt(H)
    k_dec = 1.0 / np.sqrt(H)
    ks = jax.random.split(key, 12)
    u = lambda k, shape, s: jax.random.uniform(k, shape, jnp.float32, -s, s)

    w_ih0 = u(ks[0], (4 * H, Din), k_lstm)      # torch weight_ih_l0
    w_hh0 = u(ks[1], (4 * H, H), k_lstm)
    b_ih0 = u(ks[2], (4 * H,), k_lstm)
    b_hh0 = u(ks[3], (4 * H,), k_lstm)
    w_ih1 = u(ks[4], (4 * H, H), k_lstm)
    w_hh1 = u(ks[5], (4 * H, H), k_lstm)
    b_ih1 = u(ks[6], (4 * H,), k_lstm)
    b_hh1 = u(ks[7], (4 * H,), k_lstm)
    w_dec = u(ks[8], (num_actions, H), k_dec)
    b_dec = u(ks[9], (num_actions,), k_dec)
    emb = jax.random.normal(ks[10], (num_actions, action_embed_dim), jnp.float32)

    w_ih0_t = w_ih0.T                            # (Din, 4H)
    return dict(
        action_embed=emb,
        w_ih0_img=w_ih0_t[:image_feat_dim],      # (Dimg, 4H)
        w_ih0_act=w_ih0_t[image_feat_dim:],      # (Da, 4H)
        w_hh0=w_hh0.T,                           # (H, 4H)
        b0=(b_ih0 + b_hh0).reshape(1, 4 * H),
        w_ih1=w_ih1.T,
        w_hh1=w_hh1.T,
        b1=(b_ih1 + b_hh1).reshape(1, 4 * H),
        w_dec=w_dec.T,                           # (H, A)
        b_dec=b_dec.reshape(1, num_actions),
    )


# ---------------------------------------------------------------------------
# Pure-JAX reference (packed-sequence semantics) for a correctness check.
# ---------------------------------------------------------------------------
def reference_forward(params, img_feats, question_feats, actions_in,
                      action_lengths):
    N, T, Dimg = img_feats.shape
    H = params["w_hh0"].shape[0]
    Tmax = int(max(action_lengths))
    lengths = jnp.asarray(action_lengths, jnp.int32)

    aemb = jnp.take(params["action_embed"], actions_in, axis=0)
    x = jnp.concatenate(
        [img_feats * question_feats[:, None, :], aemb], axis=-1)[:, :Tmax]
    w_ih0 = jnp.concatenate([params["w_ih0_img"], params["w_ih0_act"]], axis=0)

    def run_layer(x_tm, w_ih, w_hh, b):
        h = jnp.zeros((N, H), jnp.float32)
        c = jnp.zeros((N, H), jnp.float32)
        outs = []
        for t in range(Tmax):
            gates = x_tm[t] @ w_ih + h @ w_hh + b
            i = jax.nn.sigmoid(gates[:, :H])
            f = jax.nn.sigmoid(gates[:, H:2 * H])
            g = jnp.tanh(gates[:, 2 * H:3 * H])
            o = jax.nn.sigmoid(gates[:, 3 * H:])
            c_new = f * c + i * g
            h_new = o * jnp.tanh(c_new)
            m = (lengths > t).reshape(N, 1)
            h = jnp.where(m, h_new, h)
            c = jnp.where(m, c_new, c)
            outs.append(jnp.where(m, h, 0.0))
        return jnp.stack(outs), h, c

    x_tm = jnp.transpose(x, (1, 0, 2))
    out0, h0, c0 = run_layer(x_tm, w_ih0, params["w_hh0"], params["b0"])
    out1, h1, c1 = run_layer(out0, params["w_ih1"], params["w_hh1"],
                             params["b1"])
    rnn_out = jnp.transpose(out1, (1, 0, 2)).reshape(N * Tmax, H)
    logits = rnn_out @ params["w_dec"] + params["b_dec"]
    return logits, (jnp.stack([h0, h1]), jnp.stack([c0, c1]))


if __name__ == "__main__":
    # Small shapes consistent with the module defaults.  N=24 pads to Np=32,
    # so Kernel A runs a 2-step row grid and Kernel B a 16-step time grid.
    N, T = 24, 16
    Dimg = Dq = 128        # image_feat_dim == question_embed_dim (torch.mul)
    Da = 32                # action_embed_dim
    A = 4                  # num_actions
    H = 128                # rnn_hidden_dim

    key = jax.random.PRNGKey(0)
    k_p, k_img, k_q, k_act = jax.random.split(key, 4)

    params = init_params(k_p, Dimg, Dq, Da, A, H)
    img_feats = jax.random.normal(k_img, (N, T, Dimg), jnp.float32)
    question_feats = jax.random.normal(k_q, (N, Dq), jnp.float32)
    actions_in = jax.random.randint(k_act, (N, T), 0, A, jnp.int32)
    # sorted descending, as pack_padded_sequence requires (default)
    action_lengths = [16, 16, 15, 14, 13, 12, 12, 11, 10, 10, 9, 8,
                      8, 7, 6, 6, 5, 5, 4, 3, 3, 2, 2, 1]

    output, (h_n, c_n) = nav_rnn_mult_forward(
        params, img_feats, question_feats, actions_in, action_lengths)
    output = jax.block_until_ready(output)
    h_n = jax.block_until_ready(h_n)
    c_n = jax.block_until_ready(c_n)

    ref_out, (ref_h, ref_c) = reference_forward(
        params, img_feats, question_feats, actions_in, action_lengths)
    np.testing.assert_allclose(np.asarray(output), np.asarray(ref_out),
                               rtol=2e-2, atol=2e-2)
    np.testing.assert_allclose(np.asarray(h_n), np.asarray(ref_h),
                               rtol=2e-2, atol=2e-2)
    np.testing.assert_allclose(np.asarray(c_n), np.asarray(ref_c),
                               rtol=2e-2, atol=2e-2)

    print("KERNEL_OK")
</pallas_src>

<mosaic_0001>
module attributes {stable_mosaic.version = 11 : i64} {
  func.func @_input_proj_kernel(%arg0: i32, %arg1: memref<8x32x128xf32, #tpu.memory_space<vmem>>, %arg2: memref<32x128xf32, #tpu.memory_space<vmem>>, %arg3: memref<8x32x32xf32, #tpu.memory_space<vmem>>, %arg4: memref<128x512xbf16, #tpu.memory_space<vmem>>, %arg5: memref<32x512xbf16, #tpu.memory_space<vmem>>, %arg6: memref<1x512xf32, #tpu.memory_space<vmem>>, %arg7: memref<8x32x512xbf16, #tpu.memory_space<vmem>>) attributes {dimension_semantics = [#tpu.dimension_semantics<parallel>], iteration_bounds = array<i64: 2>, scalar_prefetch = 0 : i64, scratch_operands = 0 : i64, tpu.core_type = #tpu.core_type<tc>, window_params = [{transform_indices = @transform_0, window_bounds = array<i64: 8, 32, 128>}, {pipeline_mode = #tpu.pipeline_mode<synchronous>, transform_indices = @transform_1, window_bounds = array<i64: 32, 128>}, {transform_indices = @transform_2, window_bounds = array<i64: 8, 32, 32>}, {pipeline_mode = #tpu.pipeline_mode<synchronous>, transform_indices = @transform_3, window_bounds = array<i64: 128, 512>}, {pipeline_mode = #tpu.pipeline_mode<synchronous>, transform_indices = @transform_4, window_bounds = array<i64: 32, 512>}, {pipeline_mode = #tpu.pipeline_mode<synchronous>, transform_indices = @transform_5, window_bounds = array<i64: 1, 512>}, {transform_indices = @transform_6, window_bounds = array<i64: 8, 32, 512>}]} {
    %c0 = arith.constant 0 : index
    %c0_0 = arith.constant 0 : index
    %c0_1 = arith.constant 0 : index
    %0 = vector.load %arg1[%c0, %c0_0, %c0_1] : memref<8x32x128xf32, #tpu.memory_space<vmem>>, vector<8x32x128xf32>
    %c0_2 = arith.constant 0 : index
    %c0_3 = arith.constant 0 : index
    %1 = vector.load %arg2[%c0_2, %c0_3] : memref<32x128xf32, #tpu.memory_space<vmem>>, vector<32x128xf32>
    %2 = vector.shape_cast %1 : vector<32x128xf32> to vector<1x32x128xf32>
    %3 = vector.broadcast %2 : vector<1x32x128xf32> to vector<8x32x128xf32>
    %4 = arith.mulf %0, %3 : vector<8x32x128xf32>
    %5 = arith.truncf %4 : vector<8x32x128xf32> to vector<8x32x128xbf16>
    %6 = vector.shape_cast %5 : vector<8x32x128xbf16> to vector<256x128xbf16>
    %c0_4 = arith.constant 0 : index
    %c0_5 = arith.constant 0 : index
    %c0_6 = arith.constant 0 : index
    %7 = vector.load %arg3[%c0_4, %c0_5, %c0_6] : memref<8x32x32xf32, #tpu.memory_space<vmem>>, vector<8x32x32xf32>
    %8 = arith.truncf %7 : vector<8x32x32xf32> to vector<8x32x32xbf16>
    %9 = vector.shape_cast %8 : vector<8x32x32xbf16> to vector<256x32xbf16>
    %c0_7 = arith.constant 0 : index
    %c0_8 = arith.constant 0 : index
    %10 = vector.load %arg4[%c0_7, %c0_8] : memref<128x512xbf16, #tpu.memory_space<vmem>>, vector<128x512xbf16>
    %cst = arith.constant dense<0.000000e+00> : vector<256x512xf32>
    %11 = tpu.matmul %6, %10, %cst {dimension_numbers = #tpu.dot_dimension_numbers<[1], [0], [0], [1], [0, 0, 1, 1], [], []>} : vector<256x128xbf16>, vector<128x512xbf16>, vector<256x512xf32> -> vector<256x512xf32>
    %c0_9 = arith.constant 0 : index
    %c0_10 = arith.constant 0 : index
    %12 = vector.load %arg5[%c0_9, %c0_10] : memref<32x512xbf16, #tpu.memory_space<vmem>>, vector<32x512xbf16>
    %cst_11 = arith.constant dense<0.000000e+00> : vector<256x512xf32>
    %13 = tpu.matmul %9, %12, %cst_11 {dimension_numbers = #tpu.dot_dimension_numbers<[1], [0], [0], [1], [0, 0, 1, 1], [], []>} : vector<256x32xbf16>, vector<32x512xbf16>, vector<256x512xf32> -> vector<256x512xf32>
    %14 = arith.addf %11, %13 : vector<256x512xf32>
    %c0_12 = arith.constant 0 : index
    %c0_13 = arith.constant 0 : index
    %15 = vector.load %arg6[%c0_12, %c0_13] : memref<1x512xf32, #tpu.memory_space<vmem>>, vector<1x512xf32>
    %16 = vector.broadcast %15 : vector<1x512xf32> to vector<256x512xf32>
    %17 = arith.addf %14, %16 : vector<256x512xf32>
    %18 = arith.truncf %17 : vector<256x512xf32> to vector<256x512xbf16>
    %19 = vector.shape_cast %18 : vector<256x512xbf16> to vector<8x32x512xbf16>
    %c0_14 = arith.constant 0 : index
    %c0_15 = arith.constant 0 : index
    %c0_16 = arith.constant 0 : index
    %20 = vector.load %arg7[%c0_14, %c0_15, %c0_16] : memref<8x32x512xbf16, #tpu.memory_space<vmem>>, vector<8x32x512xbf16>
    tpu.vector_store %arg7[%c0_14, %c0_15, %c0_16], %19 {strides = array<i32>} : memref<8x32x512xbf16, #tpu.memory_space<vmem>>, vector<8x32x512xbf16>,
    return
  }
  func.func @transform_0(%arg0: i32) -> (i32, i32, i32) {
    %c0_i32 = arith.constant 0 : i32
    %c0_i32_0 = arith.constant 0 : i32
    %c0_i32_1 = arith.constant 0 : i32
    return %arg0, %c0_i32, %c0_i32_0 : i32, i32, i32
  }
  func.func @transform_1(%arg0: i32) -> (i32, i32) {
    %c0_i32 = arith.constant 0 : i32
    %c0_i32_0 = arith.constant 0 : i32
    %c0_i32_1 = arith.constant 0 : i32
    return %c0_i32, %c0_i32_0 : i32, i32
  }
  func.func @transform_2(%arg0: i32) -> (i32, i32, i32) {
    %c0_i32 = arith.constant 0 : i32
    %c0_i32_0 = arith.constant 0 : i32
    %c0_i32_1 = arith.constant 0 : i32
    return %arg0, %c0_i32, %c0_i32_0 : i32, i32, i32
  }
  func.func @transform_3(%arg0: i32) -> (i32, i32) {
    %c0_i32 = arith.constant 0 : i32
    %c0_i32_0 = arith.constant 0 : i32
    %c0_i32_1 = arith.constant 0 : i32
    return %c0_i32, %c0_i32_0 : i32, i32
  }
  func.func @transform_4(%arg0: i32) -> (i32, i32) {
    %c0_i32 = arith.constant 0 : i32
    %c0_i32_0 = arith.constant 0 : i32
    %c0_i32_1 = arith.constant 0 : i32
    return %c0_i32, %c0_i32_0 : i32, i32
  }
  func.func @transform_5(%arg0: i32) -> (i32, i32) {
    %c0_i32 = arith.constant 0 : i32
    %c0_i32_0 = arith.constant 0 : i32
    %c0_i32_1 = arith.constant 0 : i32
    return %c0_i32, %c0_i32_0 : i32, i32
  }
  func.func @transform_6(%arg0: i32) -> (i32, i32, i32) {
    %c0_i32 = arith.constant 0 : i32
    %c0_i32_0 = arith.constant 0 : i32
    %c0_i32_1 = arith.constant 0 : i32
    return %arg0, %c0_i32, %c0_i32_0 : i32, i32, i32
  }
}

</mosaic_0001>

<bundles_post_ra>
// kernel: tpu_custom_call.1
= control target key start
LH: loop header
LB: loop body
LE: loop exit
PB: predicated region body
PF: predicated region fallthrough
CT: control target
= control target key end

     0   :  { %s3788_s0 = inlined_call_operand.hbm [shape: f32[16,32,128], index: 0, kind: input, shape index: {}]   ;;  %s3789_s1 = inlined_call_operand.hbm [shape: f32[32,128], index: 1, kind: input, shape index: {}]   ;;  %s3790_s2 = inlined_call_operand.hbm [shape: f32[16,32,32], index: 2, kind: input, shape index: {}]   ;;  %s3791_s3 = inlined_call_operand.hbm [shape: bf16[128,512], index: 3, kind: input, shape index: {}]   ;;  %s3792_s4 = inlined_call_operand.hbm [shape: bf16[32,512], index: 4, kind: input, shape index: {}]   ;;  %s3793_s5 = inlined_call_operand.vmem [shape: f32[1,512], index: 5, kind: input, shape index: {}]   ;;  %s3794_s6 = inlined_call_operand.hbm [shape: bf16[16,32,512], index: 6, kind: output, shape index: {}]  }
   0x1   :  { %3817 = sst [smem:[#allocation24_spill]] %s3788_s0 }
   0x2   :  { %3818 = sst [smem:[#allocation25_spill]] %s3789_s1 }
   0x3   :  { %3819 = sst [smem:[#allocation26_spill]] %s3793_s5 }
   0x4   :  { %3820 = sst [smem:[#allocation27_spill]] %s3794_s6 }
   0x5   :  { %11 = vsyncpa [#allocation3], 0 }
   0x6   :  { %13 = vsyncpa [#allocation3 + $0x1], 0 }
   0x7   :  { %14 = vsyncpa [#allocation6], 0 }
   0x8   :  { %15 = vsyncpa [#allocation10], 0 }
   0x9   :  { %16 = vsyncpa [#allocation4], 0 }
   0xa   :  { %18 = vsyncpa [#allocation4 + $0x1], 0  ;;  %s3071_s21 = smov 0   ;;  %s3073_s22 = smov 0  }
   0xb   :  { %s3075_s23 = smov 0   ;;  %s3077_s24 = smov 0  }
   0xc LB: > { %3821 = sst [smem:[#allocation18_spill]] %s3009_s21  ;;  %s3092_s25 = sadd.s32 4294967295, %s3021_s24   ;;  %s3021_s24 = sphi %s3077_s24, %s3860_s24   ;;  %s3017_s23 = sphi %s3075_s23, %s3862_s23   ;;  %s3013_s22 = sphi %s3073_s22, %s3864_s22   ;;  %s3009_s21 = sphi %s3071_s21, %s3863_s21  }
   0xd   : > { %3822 = sst [smem:[#allocation19_spill]] %s3017_s23  ;;  %s2285_s26 = sadd.s32 4294967294, %s3021_s24  }
   0xe   : > { %p44_p0 = scmp.ne.s32.totalorder %s3013_s22, %s3009_s21  ;;  %p3795_p1 = scmp.eq.s32.totalorder %s3092_s25, 0 }
   0xf   : > { %p184_p3 = scmp.eq.s32.totalorder %s2285_s26, 1  ;;  %p2286_p5 = scmp.ge.s32.totalorder %s3021_s24, 1 }
  0x10   : > { %p3101_p4 = por %p3795_p1, %p44_p0  ;;  %p191_p7 = scmp.lt.s32.totalorder %s3021_s24, 3 }
  0x11   : > { %p3106_p6 = por %p184_p3, %p44_p0  ;;  %s3023_s30 = smov [#allocation5]  }
  0x12   : > { %s3823_s27 = scalar_select %p3101_p4, 1, 0 }
  0x13   : > { %s3824_s28 = scalar_select %p3106_p6, 1, 0 }
  0x14   : > { %p3111_p8 = pnand %p2286_p5, %p191_p7  ;;  %s203_s7 = sshll.u32 %s3023_s30, 4  ;;  %s3115_s7 = int_to_ptr.vmem [resolvable:$true] %s203_s7 }
  0x15   : > { %3825 = sst [smem:[#allocation20_spill]] %s3824_s28  ;;  %s3127_s9 = sadd.s32 1, %s3021_s24  }
  0x16   : > { %s3826_s29 = scalar_select %p3111_p8, 1, 0 }
  0x17   : > { %p2664_p9 = pneg %p3111_p8  ;;  %3828 = sst [smem:[#allocation21_spill]] %s3127_s9 }
  0x18   : > { %s31_s10 = sadd.s32 1, %s3017_s23  ;;  %s28_s11 = ssub.s32 %s3021_s24, %s3127_s9 }
  0x19   : > { %p3122_p11 = pnand %p2664_p9, %p3795_p1  ;;  %s3829_s1 = sld [smem:[#allocation25_spill]] }
  0x1b   : > { %s3827_s8 = scalar_select %p3122_p11, 1, 0 }
  0x1c   : > { %p3140_p13 = pneg %p3122_p11 }
  0x1f   : > { %s2795_s14 = scalar_lea.hbm %s3829_s1, 512 }
  0x20   : > { %p2796_p12 = scmp.ne.s32.totalorder %s3829_s1, %s2795_s14  ;;  %p2802_p5 = scmp.lt.u32.totalorder %s2795_s14, %s3829_s1 }
  0x22   : > { %p2798_p0 = pnand %p3140_p13, %p2796_p12 }
  0x24   : > { %p2799_p3 = pneg %p2798_p0 }
  0x26   : > { %p2804_p7 = pnand %p2802_p5, %p2799_p3 }
  0x28   : > { %2807 = shalt.err (!%p2804_p7)
}
  0x29   : > { %s2808_s20 = scalar_lea.vmem %s3115_s7, 512  ;;  %p2816_p2 = scmp.lt.s32.totalorder %s3115_s7, %s3115_s7 }
  0x2a   : > { %p2809_p9 = scmp.ne.s32.totalorder %s3115_s7, %s2808_s20  ;;  %p2817_p6 = scmp.lt.s32.totalorder %s2808_s20, %s2808_s20 }
  0x2c   : > { %p2811_p10 = pnand %p2809_p9, %p3140_p13  ;;  %p2818_p12 = por %p2817_p6, %p2816_p2 }
  0x2e   : > { %p2812_p1 = pneg %p2811_p10 }
  0x30   : > { %p2819_p0 = pnand %p2818_p12, %p2812_p1 }
  0x32   : > { %2822 = shalt.err (!%p2819_p0)
}
  0x33   : > { %s3796_s26 = smov 128   ;;  %s3798_s30 = smov 8  }
  0x34   : > { %2667 = dma.hbm_to_vmem [thread:$0]  (!%p3122_p11), %s3829_s1, 512, %s3115_s7, [#allocation6], %s3796_s26, %s3796_s26, %s3798_s30  }
  0x35   : > { %p29_p1 = scmp.eq.s32.totalorder %s28_s11, 0  ;;  %p38_p2 = scmp.ne.s32.totalorder %s3017_s23, %s3013_s22 }
  0x36   : > { %p39_p6 = scmp.eq.s32.totalorder %s3021_s24, 0  ;;  %p2688_p10 = scmp.lt.s32.totalorder %s3021_s24, 2 }
  0x37   : > { %s3169_s14 = scalar_select %p29_p1, %s3017_s23, %s31_s10  }
  0x38   : > { %p40_p3 = por %p39_p6, %p38_p2  ;;  %p3832_p5 = scmp.eq.s32.totalorder %s3092_s25, 1 }
  0x39   : > { %3831 = sst [smem:[#allocation22_spill]] %s3169_s14  ;;  %s246_s16 = sand.u32 1, %s3021_s24  }
  0x3a   : > { %p3173_p7 = por %p3832_p5, %p38_p2  ;;  %s248_s18 = sand.u32 1, %s3017_s23  }
  0x3b   : > { %s3179_s19 = sshll.u32 %s248_s18, 8  ;;  %s3800_s20 = sshll.u32 %s3021_s24, 12 }
  0x3c   : > { %s3833_s15 = scalar_select %p3173_p7, 1, 0 }
  0x3d   : > { %s3835_s0 = sld [smem:[#allocation24_spill]]  ;;  %s250_s10 = scalar_lea.vmem [#allocation2], %s3179_s19 }
  0x3e   : > { %3834 = sst [smem:[#allocation23_spill]] %s3833_s15  ;;  %s258_s13 = sshll.u32 %s250_s10, 4  ;;  %s3190_s13 = int_to_ptr.vmem [resolvable:$true] %s258_s13 }
  0x3f   : > { %p3192_p9 = pnand %p2688_p10, %p40_p3  ;;  %s3196_s18 = scalar_lea.sflag [#allocation3], %s246_s16 }
  0x41   : > { %s3836_s26 = scalar_select %p3192_p9, 1, 0 }
  0x42   : > { %p3811_p0 = pneg %p3192_p9 }
  0x43   : > { %s3187_s12 = scalar_lea.hbm %s3835_s0, %s3800_s20  ;;  %s2828_s10 = scalar_lea.hbm %s3835_s0, 8192 }
  0x44   : > { %s2823_s30 = scalar_lea.hbm %s3187_s12, 4096  ;;  %p2829_p6 = scmp.lt.u32.totalorder %s3187_s12, %s3835_s0 }
  0x45   : > { %p2824_p12 = scmp.ne.s32.totalorder %s3187_s12, %s2823_s30  ;;  %p2830_p10 = scmp.lt.u32.totalorder %s2828_s10, %s2823_s30 }
  0x46   : > { %p2832_p5 = scmp.lt.u32.totalorder %s2823_s30, %s3187_s12 }
  0x47   : > { %p2826_p1 = pnand %p3811_p0, %p2824_p12  ;;  %p2831_p3 = por %p2830_p10, %p2829_p6 }
  0x49   : > { %p2827_p2 = pneg %p2826_p1  ;;  %p2833_p7 = por %p2832_p5, %p2831_p3 }
  0x4b   : > { %p2834_p4 = pnand %p2833_p7, %p2827_p2 }
  0x4d   : > { %2837 = shalt.err (!%p2834_p4)
}
  0x4e   : > { %s2838_s16 = scalar_lea.vmem %s3190_s13, 4096  ;;  %s3026_s7 = smov [#allocation2]  }
  0x4f   : > { %p2839_p12 = scmp.ne.s32.totalorder %s3190_s13, %s2838_s16  ;;  %s2843_s11 = sshll.u32 %s3026_s7, 4  ;;  %s2844_s11 = int_to_ptr.vmem [resolvable:$false] %s2843_s11 }
  0x50   : > { %s2845_s1 = scalar_lea.vmem %s2844_s11, 8192  ;;  %p2846_p11 = scmp.lt.s32.totalorder %s3190_s13, %s2844_s11 }
  0x51   : > { %p2841_p1 = pnand %p2839_p12, %p3811_p0  ;;  %p2847_p6 = scmp.lt.s32.totalorder %s2845_s1, %s2838_s16 }
  0x53   : > { %p2842_p8 = pneg %p2841_p1  ;;  %p2848_p10 = por %p2847_p6, %p2846_p11 }
  0x55   : > { %p2849_p3 = pnand %p2848_p10, %p2842_p8 }
  0x57   : > { %2852 = shalt.err (!%p2849_p3)
}
  0x58   : > { %s3837_s30 = smov 8   ;;  %s3838_s20 = smov 128  }
  0x59   : > { %2677 = dma.hbm_to_vmem [thread:$0]  (!%p3192_p9), %s3187_s12, 4096, %s3190_s13, %s3196_s18, %s3838_s20, %s3838_s20, %s3837_s30  }
  0x5a   : > { %s272_s10 = scalar_lea.vmem [#allocation7], %s3179_s19  ;;  %s3027_s0 = smov [#allocation8]  }
  0x5b   : > { %s280_s7 = sshll.u32 %s272_s10, 4  ;;  %s216_s14 = sshll.u32 %s3027_s0, 4  ;;  %s217_s14 = int_to_ptr.vmem [resolvable:$true] %s216_s14  ;;  %s3253_s7 = int_to_ptr.vmem [resolvable:$true] %s280_s7 }
  0x5c   : > { %s2853_s1 = scalar_lea.hbm %s3791_s3, 4096 }
  0x5d   : > { %p2854_p4 = scmp.ne.s32.totalorder %s3791_s3, %s2853_s1  ;;  %p2860_p7 = scmp.lt.u32.totalorder %s2853_s1, %s3791_s3 }
  0x5f   : > { %p2856_p8 = pnand %p2854_p4, %p3140_p13 }
  0x61   : > { %p2857_p11 = pneg %p2856_p8 }
  0x63   : > { %p2862_p2 = pnand %p2860_p7, %p2857_p11 }
  0x65   : > { %2865 = shalt.err (!%p2862_p2)
}
  0x66   : > { %s2866_s19 = scalar_lea.vmem %s217_s14, 4096  ;;  %p2874_p6 = scmp.lt.s32.totalorder %s217_s14, %s217_s14 }
  0x67   : > { %p2867_p5 = scmp.ne.s32.totalorder %s217_s14, %s2866_s19  ;;  %p2875_p10 = scmp.lt.s32.totalorder %s2866_s19, %s2866_s19 }
  0x69   : > { %p2869_p12 = pnand %p2867_p5, %p3140_p13  ;;  %p2876_p3 = por %p2875_p10, %p2874_p6 }
  0x6b   : > { %p2870_p1 = pneg %p2869_p12 }
  0x6d   : > { %p2877_p0 = pnand %p2876_p3, %p2870_p1 }
  0x6f   : > { %2880 = shalt.err (!%p2877_p0)
}
  0x70   : > { %s3028_s0 = smov 256   ;;  %s3029_s23 = smov 16  }
  0x71   : > { %p3839_p4 = scmp.ne.s32.totalorder %s3827_s8, 0  ;;  %s3840_s9 = sshll.u32 %s3021_s24, 12 }
  0x72   : > { %s3251_s10 = scalar_lea.hbm %s3790_s2, %s3840_s9  ;;  %s3030_s16 = smov [#allocation9]  }
  0x73   : > { %2670 = dma.hbm_to_vmem [thread:$0]  (!%p3839_p4), %s3791_s3, 4096, %s217_s14, [#allocation6], %s3028_s0, %s3028_s0, %s3029_s23  }
  0x74   : > { %s229_s11 = sshll.u32 %s3030_s16, 4  ;;  %s2881_s6 = scalar_lea.hbm %s3792_s4, 1024  ;;  %s230_s11 = int_to_ptr.vmem [resolvable:$true] %s229_s11 }
  0x75   : > { %p2882_p0 = scmp.ne.s32.totalorder %s3792_s4, %s2881_s6  ;;  %p2888_p7 = scmp.lt.u32.totalorder %s2881_s6, %s3792_s4 }
  0x77   : > { %p2884_p8 = pnand %p2882_p0, %p3140_p13 }
  0x79   : > { %p2885_p11 = pneg %p2884_p8 }
  0x7b   : > { %p2890_p2 = pnand %p2888_p7, %p2885_p11 }
  0x7d   : > { %2893 = shalt.err (!%p2890_p2)
}
  0x7e   : > { %s2894_s28 = scalar_lea.vmem %s230_s11, 1024  ;;  %p2902_p6 = scmp.lt.s32.totalorder %s230_s11, %s230_s11 }
  0x7f   : > { %p2895_p5 = scmp.ne.s32.totalorder %s230_s11, %s2894_s28  ;;  %p2903_p10 = scmp.lt.s32.totalorder %s2894_s28, %s2894_s28 }
  0x81   : > { %p2897_p12 = pnand %p2895_p5, %p3140_p13  ;;  %p2904_p3 = por %p2903_p10, %p2902_p6 }
  0x83   : > { %p2898_p1 = pneg %p2897_p12 }
  0x85   : > { %p2905_p9 = pnand %p2904_p3, %p2898_p1 }
  0x87   : > { %2908 = shalt.err (!%p2905_p9)
}
  0x88   : > { %2673 = dma.hbm_to_vmem [thread:$0]  (!%p3839_p4), %s3792_s4, 1024, %s230_s11, [#allocation10], %s3028_s0, %s3028_s0, %s3029_s23  }
  0x89   : > { %s2909_s6 = scalar_lea.hbm %s3251_s10, 4096  ;;  %p3841_p13 = scmp.ne.s32.totalorder %s3836_s26, 0 }
  0x8a   : > { %p2910_p0 = scmp.ne.s32.totalorder %s3251_s10, %s2909_s6  ;;  %s2914_s12 = scalar_lea.hbm %s3790_s2, 8192 }
  0x8b   : > { %p3842_p8 = pneg %p3841_p13  ;;  %p2915_p9 = scmp.lt.u32.totalorder %s3251_s10, %s3790_s2 }
  0x8c   : > { %p2916_p2 = scmp.lt.u32.totalorder %s2914_s12, %s2909_s6  ;;  %p2918_p12 = scmp.lt.u32.totalorder %s2909_s6, %s3251_s10 }
  0x8d   : > { %p2912_p11 = pnand %p2910_p0, %p3842_p8 }
  0x8e   : > { %p2917_p5 = por %p2916_p2, %p2915_p9 }
  0x8f   : > { %p2913_p7 = pneg %p2912_p11 }
  0x90   : > { %p2919_p1 = por %p2918_p12, %p2917_p5 }
  0x92   : > { %p2920_p6 = pnand %p2919_p1, %p2913_p7 }
  0x94   : > { %2923 = shalt.err (!%p2920_p6)
}
  0x95   : > { %s2924_s0 = scalar_lea.vmem %s3253_s7, 4096  ;;  %p3843_p10 = pmov %p3842_p8 }
  0x96   : > { %p2925_p4 = scmp.ne.s32.totalorder %s3253_s7, %s2924_s0  ;;  %s3031_s23 = smov [#allocation7]  }
  0x97   : > { %s2929_s16 = sshll.u32 %s3031_s23, 4  ;;  %s2930_s16 = int_to_ptr.vmem [resolvable:$false] %s2929_s16 }
  0x98   : > { %p2927_p3 = pnand %p2925_p4, %p3843_p10  ;;  %s2931_s11 = scalar_lea.vmem %s2930_s16, 8192 }
  0x99   : > { %p2932_p8 = scmp.lt.s32.totalorder %s3253_s7, %s2930_s16  ;;  %p2933_p11 = scmp.lt.s32.totalorder %s2931_s11, %s2924_s0 }
  0x9a   : > { %p2928_p0 = pneg %p2927_p3 }
  0x9b   : > { %p2934_p9 = por %p2933_p11, %p2932_p8 }
  0x9d   : > { %p2935_p2 = pnand %p2934_p9, %p2928_p0 }
  0x9f   : > { %2938 = shalt.err (!%p2935_p2)
}
  0xa0   : > { %2680 = dma.hbm_to_vmem [thread:$0]  (!%p3841_p13), %s3251_s10, 4096, %s3253_s7, %s3196_s18, %s3838_s20, %s3838_s20, %s3837_s30  }
  0xa1   : > { %p3844_p7 = scmp.ne.s32.totalorder %s3826_s29, 0 }
  0xa2   : > { %s294_s1 = sand.u32 (!%p3844_p7), 1, %s3092_s25   ;;  %s3304_s19 = sand.u32 (!%p3844_p7), 1, %s3013_s22  }
  0xa3   : > { %292 = sbr.rel (%p3844_p7) target bundleno = 675 (0x2a3), region = 44  ;;  %s2300_s14 = sshll.u32 (!%p3844_p7), %s3304_s19, 8 }
  0xa4   : > { %s295_s21 = scalar_lea.sflag (!%p3844_p7), [#allocation3], %s294_s1  ;;  %s3307_s26 = scalar_lea.vmem (!%p3844_p7), [#allocation2], %s2300_s14 }
  0xa5   : > { %p3845_p5 = scmp.ne.s32.totalorder (!%p3844_p7), %s3823_s27, 0 }
  0xaa   : > { %2984 = dma.done.wait (%p3845_p5), %s295_s21, 4096  }
  0xab   : > { %2986 = vsyncadd (%p3845_p5), %s295_s21, 4294963200  ;;  %p3846_p13 = scmp.eq.s32.totalorder %s3092_s25, 0 }
  0xad   : > { %2988 = dma.done.wait (%p3846_p13), [#allocation6], 512   ;;  %p3847_p12 = pmov %p3846_p13 }
  0xae   : > { %s3317_s29 = scalar_lea.vmem [#allocation7], %s2300_s14 }
  0xaf   : > { %2990 = vsyncadd (%p3847_p12), [#allocation6], 4294966784 }
  0xb0   : > { %2992 = dma.done.wait (%p3845_p5), %s295_s21, 4096  }
  0xb1   : > { %2994 = vsyncadd (%p3845_p5), %s295_s21, 4294963200  ;;  %p3848_p1 = pmov %p3847_p12 }
  0xb3   : > { %2996 = dma.done.wait (%p3848_p1), [#allocation6], 4096   ;;  %p3849_p6 = pmov %p3848_p1 }
  0xb4   : > { %p3850_p4 = pmov %p3848_p1 }
  0xb5   : > { %2998 = vsyncadd (%p3849_p6), [#allocation6], 4294963200 }
  0xb6   : > { %3000 = dma.done.wait (%p3850_p4), [#allocation10], 1024   ;;  %p3851_p10 = pmov %p3848_p1 }
  0xb7   : > { %v3032_v0 = vmov 0   ;;  %v2735_v1 = vld [vmem:[#allocation9 + $0x4] ss:$16 sps:$4 sm:$0xff]   ;;  %v2737_v2 = vld [vmem:[#allocation9 + $0xc] ss:$16 sps:$4 sm:$0xff]   ;;  %vm569_vm0 = vcmask 261120  }
  0xb8   : > { %3002 = vsyncadd (%p3851_p10), [#allocation10], 4294966272  ;;  %650 = vmatprep.mubr.bf16.mxu0 %v3032_v0  ;;  %843 = vmatprep.mubr.bf16.mxu1 %v3032_v0  ;;  %v2739_v3 = vld [vmem:[#allocation9] ss:$16 sps:$4 sm:$0xff]   ;;  %v2740_v4 = vld [vmem:[#allocation9 + $0x8] ss:$16 sps:$4 sm:$0xff]  }
  0xb9   : > { %618 = vmatprep.subr.bf16.mxu0 %v2735_v1  ;;  %811 = vmatprep.subr.bf16.mxu1 %v2737_v2  ;;  %v2741_v5 = vld [vmem:[#allocation9 + $0x24] ss:$16 sps:$4 sm:$0xff]   ;;  %v2743_v6 = vld [vmem:[#allocation9 + $0x2c] ss:$16 sps:$4 sm:$0xff]   ;;  %v2745_v7 = vld [vmem:[#allocation9 + $0x20] ss:$16 sps:$4 sm:$0xff]  }
  0xba   : > { %619 = vmatpush1.bf16.msra.mxu0 %v2739_v3  ;;  %812 = vmatpush1.bf16.msra.mxu1 %v2740_v4  ;;  %v2746_v8 = vld [vmem:[#allocation9 + $0x28] ss:$16 sps:$4 sm:$0xff]   ;;  %v441_v9 = vld [vmem:[%s3317_s29] sm:$0xff]  ;;  %v2752_v15 = vld [vmem:[#allocation8 + $0xc] ss:$16 sps:$4 sm:$0xff]   ;;  %s3852_s30 = sld [smem:[#allocation26_spill]] }
  0xbb   : > { %620 = vmatprep.subr.bf16.mxu0 %v2741_v5  ;;  %v442_v10 = vld [vmem:[%s3317_s29 + $0x8] sm:$0xff]  ;;  %813 = vmatprep.subr.bf16.mxu1 %v2743_v6  ;;  %v2749_v12 = vld [vmem:[#allocation8 + $0x4] ss:$16 sps:$4 sm:$0xff]   ;;  %v2747_v13 = vld [vmem:[#allocation8] ss:$16 sps:$4 sm:$0xff]   ;;  %s2305_s20 = sshll.u32 %s3304_s19, 9 }
  0xbc   : > { %v473_v11 = vpack.c.bf16 %v442_v10, %v441_v9  ;;  %v2750_v14 = vld [vmem:[#allocation8 + $0x8] ss:$16 sps:$4 sm:$0xff]   ;;  %v443_v16 = vld [vmem:[%s3317_s29 + $0x10] sm:$0xff]  ;;  %v2758_v21 = vld [vmem:[#allocation8 + $0x2c] ss:$16 sps:$4 sm:$0xff]   ;;  %s3551_s7 = scalar_lea.vmem [#allocation11], %s2305_s20 }
  0xbd   : > { %v444_v17 = vld [vmem:[%s3317_s29 + $0x18] sm:$0xff]  ;;  %v2755_v18 = vld [vmem:[#allocation8 + $0x24] ss:$16 sps:$4 sm:$0xff]   ;;  %v2753_v19 = vld [vmem:[#allocation8 + $0x20] ss:$16 sps:$4 sm:$0xff]   ;;  %s2517_s10 = sshll.u32 %s3092_s25, 13 }
  0xbe   : > { %621 = vmatpush1.bf16.msra.mxu0 %v2745_v7  ;;  %814 = vmatpush1.bf16.msra.mxu1 %v2746_v8  ;;  %v2756_v20 = vld [vmem:[#allocation8 + $0x28] ss:$16 sps:$4 sm:$0xff]   ;;  %v474_v22 = vpack.c.bf16 %v444_v17, %v443_v16  ;;  %v2761_v23 = vld [vmem:[#allocation8 + $0x44] ss:$16 sps:$4 sm:$0xff]   ;;  %v2764_v24 = vld [vmem:[#allocation8 + $0x4c] ss:$16 sps:$4 sm:$0xff]  }
  0xbf   : > { %1164 = vmatprep.subr.bf16.mxu0 %v2749_v12  ;;  %1357 = vmatprep.subr.bf16.mxu1 %v2752_v15  ;;  %v2759_v25 = vld [vmem:[#allocation8 + $0x40] ss:$16 sps:$4 sm:$0xff]   ;;  %v2762_v26 = vld [vmem:[#allocation8 + $0x48] ss:$16 sps:$4 sm:$0xff]   ;;  %v2767_v27 = vld [vmem:[#allocation8 + $0x64] ss:$16 sps:$4 sm:$0xff]  }
  0xc0   : > { %v445_v28 = vld [vmem:[%s3317_s29 + $0x20] sm:$0xff]  ;;  %v446_v29 = vld [vmem:[%s3317_s29 + $0x28] sm:$0xff]  ;;  %v447_v39 = vld [vmem:[%s3317_s29 + $0x30] sm:$0xff]  ;;  %s2163_s28 = sshll.u32 %s3551_s7, 4  ;;  %s3853_s5 = sld [smem:[#allocation23_spill]]  ;;  %s3740_s28 = int_to_ptr.vmem [resolvable:$true] %s2163_s28 }
  0xc1   : > { %2314 = vmatmul.mubr.msk.bf16.vlgmr.msra.gmra.mrb[0].mxu0 %vm569_vm0, %v473_v11  ;;  %2330 = vmatmul.mubr.msk.bf16.vlgmr.msra.gmra.mrb[0].mxu1 %vm569_vm0, %v473_v11  ;;  %v2770_v30 = vld [vmem:[#allocation8 + $0x6c] ss:$16 sps:$4 sm:$0xff]   ;;  %v2765_v31 = vld [vmem:[#allocation8 + $0x60] ss:$16 sps:$4 sm:$0xff]   ;;  %v2768_v32 = vld [vmem:[#allocation8 + $0x68] ss:$16 sps:$4 sm:$0xff]   ;;  %v475_v33 = vpack.c.bf16 %v446_v29, %v445_v28 }
  0xc2   : > { %1165 = vmatpush1.bf16.msra.mxu0 %v2747_v13  ;;  %1358 = vmatpush1.bf16.msra.mxu1 %v2750_v14  ;;  %v2773_v34 = vld [vmem:[#allocation8 + $0x84] ss:$16 sps:$4 sm:$0xff]   ;;  %v2776_v35 = vld [vmem:[#allocation8 + $0x8c] ss:$16 sps:$4 sm:$0xff]   ;;  %v2771_v36 = vld [vmem:[#allocation8 + $0x80] ss:$16 sps:$4 sm:$0xff]  }
  0xc3   : > { %660 = vmatprep.mubr.bf16.mxu0 %v3032_v0  ;;  %853 = vmatprep.mubr.bf16.mxu1 %v3032_v0  ;;  %v2774_v37 = vld [vmem:[#allocation8 + $0x88] ss:$16 sps:$4 sm:$0xff]   ;;  %v2779_v38 = vld [vmem:[#allocation8 + $0xa4] ss:$16 sps:$4 sm:$0xff]   ;;  %v2782_v41 = vld [vmem:[#allocation8 + $0xac] ss:$16 sps:$4 sm:$0xff]  }
  0xc4   : > { %1166 = vmatprep.subr.bf16.mxu0 %v2755_v18  ;;  %1359 = vmatprep.subr.bf16.mxu1 %v2758_v21  ;;  %v448_v40 = vld [vmem:[%s3317_s29 + $0x38] sm:$0xff]  ;;  %v2777_v42 = vld [vmem:[#allocation8 + $0xa0] ss:$16 sps:$4 sm:$0xff]   ;;  %v2785_v45 = vld [vmem:[#allocation8 + $0xc4] ss:$16 sps:$4 sm:$0xff]   ;;  %s3854_s25 = sld [smem:[#allocation27_spill]] }
  0xc5   : > { %v2780_v43 = vld [vmem:[#allocation8 + $0xa8] ss:$16 sps:$4 sm:$0xff]   ;;  %v476_v44 = vpack.c.bf16 %v448_v40, %v447_v39  ;;  %v2788_v46 = vld [vmem:[#allocation8 + $0xcc] ss:$16 sps:$4 sm:$0xff]   ;;  %v2783_v47 = vld [vmem:[#allocation8 + $0xc0] ss:$16 sps:$4 sm:$0xff]  }
  0xc6   : > { %1167 = vmatpush1.bf16.msra.mxu0 %v2753_v19  ;;  %1360 = vmatpush1.bf16.msra.mxu1 %v2756_v20  ;;  %v2786_v48 = vld [vmem:[#allocation8 + $0xc8] ss:$16 sps:$4 sm:$0xff]   ;;  %v2791_v49 = vld [vmem:[#allocation8 + $0xe4] ss:$16 sps:$4 sm:$0xff]   ;;  %v2794_v52 = vld [vmem:[#allocation8 + $0xec] ss:$16 sps:$4 sm:$0xff]  }
  0xc7   : > { %1168 = vmatprep.subr.bf16.mxu0 %v2761_v23  ;;  %1361 = vmatprep.subr.bf16.mxu1 %v2764_v24  ;;  %v449_v50 = vld [vmem:[%s3317_s29 + $0x40] sm:$0xff]  ;;  %v450_v51 = vld [vmem:[%s3317_s29 + $0x48] sm:$0xff]  ;;  %v451_v56 = vld [vmem:[%s3317_s29 + $0x50] sm:$0xff]  ;;  %s2149_s9 = scalar_lea.sflag [#allocation4], %s3304_s19  ;;  %s2939_s12 = scalar_lea.vmem %s3740_s28, 8192 }
  0xc8   : > { %v2789_v53 = vld [vmem:[#allocation8 + $0xe0] ss:$16 sps:$4 sm:$0xff]   ;;  %v2792_v54 = vld [vmem:[#allocation8 + $0xe8] ss:$16 sps:$4 sm:$0xff]   ;;  %v477_v55 = vpack.c.bf16 %v450_v51, %v449_v50  ;;  %p2940_p3 = scmp.ne.s32.totalorder %s3740_s28, %s2939_s12  ;;  %p3855_p0 = scmp.ne.s32.totalorder %s3853_s5, 0 }
  0xc9   : > { %2315 = vmatmul.mubr.msk.bf16.gmra.mrb[4].mxu0 %vm569_vm0, %v474_v22  ;;  %2331 = vmatmul.mubr.msk.bf16.gmra.mrb[4].mxu1 %vm569_vm0, %v474_v22  ;;  %v452_v57 = vld [vmem:[%s3317_s29 + $0x58] sm:$0xff]  ;;  %v453_v59 = vld [vmem:[%s3317_s29 + $0x60] sm:$0xff]  ;;  %v454_v60 = vld [vmem:[%s3317_s29 + $0x68] sm:$0xff]  ;;  %s3033_s8 = smov [#allocation11]  }
  0xca   : > { %670 = vmatprep.mubr.bf16.mxu0 %v3032_v0  ;;  %863 = vmatprep.mubr.bf16.mxu1 %v3032_v0  ;;  %v478_v58 = vpack.c.bf16 %v452_v57, %v451_v56  ;;  %v479_v61 = vpack.c.bf16 %v454_v60, %v453_v59  ;;  %v455_v62 = vld [vmem:[%s3317_s29 + $0x70] sm:$0xff]  ;;  %v456_v63 = vld [vmem:[%s3317_s29 + $0x78] sm:$0xff]  ;;  %v457_v2 = vld [vmem:[%s3317_s29 + $0x80] sm:$0xff]  ;;  %s3738_s17 = scalar_lea.hbm %s3854_s25, %s2517_s10  ;;  %p2941_p8 = pnand %p2940_p3, %p3855_p0 }
  0xcb   : > { %1169 = vmatpush1.bf16.msra.mxu0 %v2759_v25  ;;  %1362 = vmatpush1.bf16.msra.mxu1 %v2762_v26  ;;  %v480_v1 = vpack.c.bf16 %v456_v63, %v455_v62  ;;  %v458_v3 = vld [vmem:[%s3317_s29 + $0x88] sm:$0xff]  ;;  %v459_v5 = vld [vmem:[%s3317_s29 + $0x90] sm:$0xff]  ;;  %v460_v6 = vld [vmem:[%s3317_s29 + $0x98] sm:$0xff]  ;;  %s2943_s13 = sshll.u32 %s3033_s8, 4  ;;  %s2944_s13 = int_to_ptr.vmem [resolvable:$false] %s2943_s13 }
  0xcc   : > { %1170 = vmatprep.subr.bf16.mxu0 %v2767_v27  ;;  %1363 = vmatprep.subr.bf16.mxu1 %v2770_v30  ;;  %v481_v4 = vpack.c.bf16 %v458_v3, %v457_v2  ;;  %v482_v7 = vpack.c.bf16 %v460_v6, %v459_v5  ;;  %v461_v8 = vld [vmem:[%s3317_s29 + $0xa0] sm:$0xff]  ;;  %v462_v9 = vld [vmem:[%s3317_s29 + $0xa8] sm:$0xff]  ;;  %v463_v11 = vld [vmem:[%s3317_s29 + $0xb0] sm:$0xff]  ;;  %p2942_p11 = pneg %p2941_p8  ;;  %s2945_s0 = scalar_lea.vmem %s2944_s13, 16384 }
  0xcd   : > { %v483_v10 = vpack.c.bf16 %v462_v9, %v461_v8  ;;  %v464_v12 = vld [vmem:[%s3317_s29 + $0xb8] sm:$0xff]  ;;  %v465_v14 = vld [vmem:[%s3317_s29 + $0xc0] sm:$0xff]  ;;  %v466_v15 = vld [vmem:[%s3317_s29 + $0xc8] sm:$0xff]  ;;  %p2946_p9 = scmp.lt.s32.totalorder %s3740_s28, %s2944_s13  ;;  %p2947_p2 = scmp.lt.s32.totalorder %s2945_s0, %s2939_s12 }
  0xce   : > { %v484_v13 = vpack.c.bf16 %v464_v12, %v463_v11  ;;  %v485_v16 = vpack.c.bf16 %v466_v15, %v465_v14  ;;  %v467_v17 = vld [vmem:[%s3317_s29 + $0xd0] sm:$0xff]  ;;  %v468_v18 = vld [vmem:[%s3317_s29 + $0xd8] sm:$0xff]  ;;  %v469_v20 = vld [vmem:[%s3317_s29 + $0xe0] sm:$0xff] }
  0xcf   : > { %1171 = vmatpush1.bf16.msra.mxu0 %v2765_v31  ;;  %1364 = vmatpush1.bf16.msra.mxu1 %v2768_v32  ;;  %v486_v19 = vpack.c.bf16 %v468_v18, %v467_v17  ;;  %v470_v21 = vld [vmem:[%s3317_s29 + $0xe8] sm:$0xff]  ;;  %v471_v23 = vld [vmem:[%s3317_s29 + $0xf0] sm:$0xff]  ;;  %v472_v24 = vld [vmem:[%s3317_s29 + $0xf8] sm:$0xff]  ;;  %p2948_p7 = por %p2947_p2, %p2946_p9 }
  0xd0   : > { %1172 = vmatprep.subr.bf16.mxu0 %v2773_v34  ;;  %1365 = vmatprep.subr.bf16.mxu1 %v2776_v35  ;;  %v487_v22 = vpack.c.bf16 %v470_v21, %v469_v20  ;;  %v488_v25 = vpack.c.bf16 %v472_v24, %v471_v23  ;;  %v357_v26 = vld [vmem:[%s3307_s26] sm:$0xff]  ;;  %v358_v27 = vld [vmem:[%s3307_s26 + $0x8] sm:$0xff]  ;;  %v360_v34 = vld [vmem:[%s3307_s26 + $0x18] sm:$0xff] }
  0xd1   : > { %2316 = vmatmul.mubr.msk.bf16.gmra.mrb[8].mxu0 %vm569_vm0, %v475_v33  ;;  %2332 = vmatmul.mubr.msk.bf16.gmra.mrb[8].mxu1 %vm569_vm0, %v475_v33  ;;  %v3427_v28 = vld [vmem:[#allocation5] sm:$0xff]  ;;  %v3429_v29 = vld [vmem:[#allocation5 + $0x8] sm:$0xff]  ;;  %v359_v33 = vld [vmem:[%s3307_s26 + $0x10] sm:$0xff]  ;;  %p2949_p5 = pnand %p2948_p7, %p2942_p11 }
  0xd2   : > { %680 = vmatprep.mubr.bf16.mxu0 %v3032_v0  ;;  %873 = vmatprep.mubr.bf16.mxu1 %v3032_v0  ;;  %v393_v30 = vmul.f32 %v3427_v28, %v357_v26  ;;  %v394_v31 = vmul.f32 %v3429_v29, %v358_v27  ;;  %v3439_v35 = vld [vmem:[#allocation5 + $0x10] sm:$0xff]  ;;  %v361_v40 = vld [vmem:[%s3307_s26 + $0x20] sm:$0xff]  ;;  %v366_v51 = vld [vmem:[%s3307_s26 + $0x48] sm:$0xff] }
  0xd3   : > { %1173 = vmatpush1.bf16.msra.mxu0 %v2771_v36  ;;  %1366 = vmatpush1.bf16.msra.mxu1 %v2774_v37  ;;  %v3441_v36 = vld [vmem:[#allocation5 + $0x18] sm:$0xff]  ;;  %v395_v37 = vmul.f32 %v3439_v35, %v359_v33  ;;  %v365_v50 = vld [vmem:[%s3307_s26 + $0x40] sm:$0xff]  ;;  %v371_v2 = vld [vmem:[%s3307_s26 + $0x70] sm:$0xff] }
  0xd4   : > { %1174 = vmatprep.subr.bf16.mxu0 %v2779_v38  ;;  %1367 = vmatprep.subr.bf16.mxu1 %v2782_v41  ;;  %v425_v32 = vpack.c.bf16 %v394_v31, %v393_v30  ;;  %v396_v38 = vmul.f32 %v3441_v36, %v360_v34  ;;  %v362_v41 = vld [vmem:[%s3307_s26 + $0x28] sm:$0xff]  ;;  %v368_v56 = vld [vmem:[%s3307_s26 + $0x58] sm:$0xff]  ;;  %v369_v60 = vld [vmem:[%s3307_s26 + $0x60] sm:$0xff] }
  0xd5   : > { %v405_v62 = vmul.f32 %v3427_v28, %v369_v60  ;;  %v372_v3 = vld [vmem:[%s3307_s26 + $0x78] sm:$0xff]  ;;  %v374_v8 = vld [vmem:[%s3307_s26 + $0x88] sm:$0xff]  ;;  %v375_v12 = vld [vmem:[%s3307_s26 + $0x90] sm:$0xff] }
  0xd6   : > { %v426_v39 = vpack.c.bf16 %v396_v38, %v395_v37  ;;  %v408_v5 = vmul.f32 %v3441_v36, %v372_v3  ;;  %v411_v14 = vmul.f32 %v3439_v35, %v375_v12  ;;  %v377_v17 = vld [vmem:[%s3307_s26 + $0xa0] sm:$0xff]  ;;  %v378_v18 = vld [vmem:[%s3307_s26 + $0xa8] sm:$0xff]  ;;  %v380_v23 = vld [vmem:[%s3307_s26 + $0xb8] sm:$0xff] }
  0xd7   : > { %1175 = vmatpush1.bf16.msra.mxu0 %v2777_v42  ;;  %1368 = vmatpush1.bf16.msra.mxu1 %v2780_v43  ;;  %v397_v42 = vmul.f32 %v3427_v28, %v361_v40  ;;  %v398_v43 = vmul.f32 %v3429_v29, %v362_v41  ;;  %v414_v20 = vmul.f32 %v3429_v29, %v378_v18  ;;  %v381_v27 = vld [vmem:[%s3307_s26 + $0xc0] sm:$0xff]  ;;  %v382_v30 = vld [vmem:[%s3307_s26 + $0xc8] sm:$0xff]  ;;  %v383_v34 = vld [vmem:[%s3307_s26 + $0xd0] sm:$0xff] }
  0xd8   : > { %1176 = vmatprep.subr.bf16.mxu0 %v2785_v45  ;;  %1369 = vmatprep.subr.bf16.mxu1 %v2788_v46  ;;  %v363_v45 = vld [vmem:[%s3307_s26 + $0x30] sm:$0xff]  ;;  %v364_v46 = vld [vmem:[%s3307_s26 + $0x38] sm:$0xff]  ;;  %v417_v31 = vmul.f32 %v3427_v28, %v381_v27  ;;  %v419_v38 = vmul.f32 %v3439_v35, %v383_v34  ;;  %v385_v41 = vld [vmem:[%s3307_s26 + $0xe0] sm:$0xff] }
  0xd9   : > { %2317 = vmatmul.mubr.msk.bf16.gmra.mrb[12].mxu0 %vm569_vm0, %v476_v44  ;;  %2333 = vmatmul.mubr.msk.bf16.gmra.mrb[12].mxu1 %vm569_vm0, %v476_v44  ;;  %v427_v44 = vpack.c.bf16 %v398_v43, %v397_v42  ;;  %v384_v37 = vld [vmem:[%s3307_s26 + $0xd8] sm:$0xff]  ;;  %v386_v42 = vld [vmem:[%s3307_s26 + $0xe8] sm:$0xff]  ;;  %v421_v43 = vmul.f32 %v3427_v28, %v385_v41 }
  0xda   : > { %690 = vmatprep.mubr.bf16.mxu0 %v3032_v0  ;;  %883 = vmatprep.mubr.bf16.mxu1 %v3032_v0 }
  0xdb   : > { %1177 = vmatpush1.bf16.msra.mxu0 %v2783_v47  ;;  %1370 = vmatpush1.bf16.msra.mxu1 %v2786_v48  ;;  %v399_v47 = vmul.f32 %v3439_v35, %v363_v45  ;;  %v400_v48 = vmul.f32 %v3441_v36, %v364_v46  ;;  %v387_v46 = vld [vmem:[%s3307_s26 + $0xf0] sm:$0xff] }
  0xdc   : > { %1178 = vmatprep.subr.bf16.mxu0 %v2791_v49  ;;  %1371 = vmatprep.subr.bf16.mxu1 %v2794_v52  ;;  %v401_v52 = vmul.f32 %v3427_v28, %v365_v50 }
  0xdd   : > { %v428_v49 = vpack.c.bf16 %v400_v48, %v399_v47  ;;  %v388_v47 = vld [vmem:[%s3307_s26 + $0xf8] sm:$0xff]  ;;  %v423_v48 = vmul.f32 %v3439_v35, %v387_v46 }
  0xdf   : > { %1179 = vmatpush1.bf16.msra.mxu0 %v2789_v53  ;;  %1372 = vmatpush1.bf16.msra.mxu1 %v2792_v54  ;;  %v402_v53 = vmul.f32 %v3429_v29, %v366_v51 }
  0xe1   : > { %2318 = vmatmul.mubr.msk.bf16.gmra.mrb[16].mxu0 %vm569_vm0, %v477_v55  ;;  %2334 = vmatmul.mubr.msk.bf16.gmra.mrb[16].mxu1 %vm569_vm0, %v477_v55  ;;  %v429_v54 = vpack.c.bf16 %v402_v53, %v401_v52  ;;  %v367_v55 = vld [vmem:[%s3307_s26 + $0x50] sm:$0xff]  ;;  %v1550_v53 = vld [vmem:[%s3852_s30] sm:$0xf] }
  0xe2   : > { %700 = vmatprep.mubr.bf16.mxu0 %v3032_v0  ;;  %893 = vmatprep.mubr.bf16.mxu1 %v3032_v0  ;;  %v403_v57 = vmul.f32 %v3439_v35, %v367_v55 }
  0xe9   : > { %2319 = vmatmul.mubr.msk.bf16.gmra.mrb[20].mxu0 %vm569_vm0, %v478_v58  ;;  %2335 = vmatmul.mubr.msk.bf16.gmra.mrb[20].mxu1 %vm569_vm0, %v478_v58  ;;  %v404_v58 = vmul.f32 %v3441_v36, %v368_v56 }
  0xea   : > { %710 = vmatprep.mubr.bf16.mxu0 %v3032_v0  ;;  %903 = vmatprep.mubr.bf16.mxu1 %v3032_v0 }
  0xeb   : > { %v430_v59 = vpack.c.bf16 %v404_v58, %v403_v57 }
  0xf1   : > { %2320 = vmatmul.mubr.msk.bf16.gmra.mrb[24].mxu0 %vm569_vm0, %v479_v61  ;;  %2336 = vmatmul.mubr.msk.bf16.gmra.mrb[24].mxu1 %vm569_vm0, %v479_v61  ;;  %v370_v61 = vld [vmem:[%s3307_s26 + $0x68] sm:$0xff] }
  0xf2   : > { %720 = vmatprep.mubr.bf16.mxu0 %v3032_v0  ;;  %913 = vmatprep.mubr.bf16.mxu1 %v3032_v0  ;;  %v406_v63 = vmul.f32 %v3429_v29, %v370_v61 }
  0xf9   : > { %2321 = vmatmul.mubr.msk.bf16.gmra.mrb[28].mxu0 %vm569_vm0, %v480_v1  ;;  %2337 = vmatmul.mubr.msk.bf16.gmra.mrb[28].mxu1 %vm569_vm0, %v480_v1  ;;  %v431_v1 = vpack.c.bf16 %v406_v63, %v405_v62 }
  0xfa   : > { %730 = vmatprep.mubr.bf16.mxu0 %v3032_v0  ;;  %923 = vmatprep.mubr.bf16.mxu1 %v3032_v0 }
 0x101   : > { %2322 = vmatmul.mubr.msk.bf16.gmra.mrb[32].mxu0 %vm569_vm0, %v481_v4  ;;  %2338 = vmatmul.mubr.msk.bf16.gmra.mrb[32].mxu1 %vm569_vm0, %v481_v4  ;;  %v407_v4 = vmul.f32 %v3439_v35, %v371_v2 }
 0x102   : > { %740 = vmatprep.mubr.bf16.mxu0 %v3032_v0  ;;  %933 = vmatprep.mubr.bf16.mxu1 %v3032_v0 }
 0x103   : > { %v432_v6 = vpack.c.bf16 %v408_v5, %v407_v4 }
 0x109   : > { %2323 = vmatmul.mubr.msk.bf16.gmra.mrb[36].mxu0 %vm569_vm0, %v482_v7  ;;  %2339 = vmatmul.mubr.msk.bf16.gmra.mrb[36].mxu1 %vm569_vm0, %v482_v7  ;;  %v373_v7 = vld [vmem:[%s3307_s26 + $0x80] sm:$0xff] }
 0x10a   : > { %750 = vmatprep.mubr.bf16.mxu0 %v3032_v0  ;;  %943 = vmatprep.mubr.bf16.mxu1 %v3032_v0  ;;  %v409_v9 = vmul.f32 %v3427_v28, %v373_v7 }
 0x111   : > { %2324 = vmatmul.mubr.msk.bf16.gmra.mrb[40].mxu0 %vm569_vm0, %v483_v10  ;;  %2340 = vmatmul.mubr.msk.bf16.gmra.mrb[40].mxu1 %vm569_vm0, %v483_v10  ;;  %v410_v10 = vmul.f32 %v3429_v29, %v374_v8 }
 0x112   : > { %760 = vmatprep.mubr.bf16.mxu0 %v3032_v0  ;;  %953 = vmatprep.mubr.bf16.mxu1 %v3032_v0 }
 0x113   : > { %v433_v11 = vpack.c.bf16 %v410_v10, %v409_v9 }
 0x119   : > { %2325 = vmatmul.mubr.msk.bf16.gmra.mrb[44].mxu0 %vm569_vm0, %v484_v13  ;;  %2341 = vmatmul.mubr.msk.bf16.gmra.mrb[44].mxu1 %vm569_vm0, %v484_v13  ;;  %v376_v13 = vld [vmem:[%s3307_s26 + $0x98] sm:$0xff] }
 0x11a   : > { %770 = vmatprep.mubr.bf16.mxu0 %v3032_v0  ;;  %963 = vmatprep.mubr.bf16.mxu1 %v3032_v0  ;;  %v412_v15 = vmul.f32 %v3441_v36, %v376_v13 }
 0x121   : > { %2326 = vmatmul.mubr.msk.bf16.gmra.mrb[48].mxu0 %vm569_vm0, %v485_v16  ;;  %2342 = vmatmul.mubr.msk.bf16.gmra.mrb[48].mxu1 %vm569_vm0, %v485_v16  ;;  %v434_v16 = vpack.c.bf16 %v412_v15, %v411_v14 }
 0x122   : > { %780 = vmatprep.mubr.bf16.mxu0 %v3032_v0  ;;  %973 = vmatprep.mubr.bf16.mxu1 %v3032_v0 }
 0x129   : > { %2327 = vmatmul.mubr.msk.bf16.gmra.mrb[52].mxu0 %vm569_vm0, %v486_v19  ;;  %2343 = vmatmul.mubr.msk.bf16.gmra.mrb[52].mxu1 %vm569_vm0, %v486_v19  ;;  %v413_v19 = vmul.f32 %v3427_v28, %v377_v17 }
 0x12a   : > { %790 = vmatprep.mubr.bf16.mxu0 %v3032_v0  ;;  %983 = vmatprep.mubr.bf16.mxu1 %v3032_v0 }
 0x12b   : > { %v435_v21 = vpack.c.bf16 %v414_v20, %v413_v19 }
 0x131   : > { %2328 = vmatmul.mubr.msk.bf16.gmra.mrb[56].mxu0 %vm569_vm0, %v487_v22  ;;  %2344 = vmatmul.mubr.msk.bf16.gmra.mrb[56].mxu1 %vm569_vm0, %v487_v22  ;;  %v379_v22 = vld [vmem:[%s3307_s26 + $0xb0] sm:$0xff] }
 0x132   : > { %800 = vmatprep.mubr.bf16.mxu0 %v3032_v0  ;;  %993 = vmatprep.mubr.bf16.mxu1 %v3032_v0  ;;  %v415_v24 = vmul.f32 %v3439_v35, %v379_v22 }
 0x139   : > { %2329 = vmatmul.mubr.msk.bf16.gmra.mrb[60].mxu0 %vm569_vm0, %v488_v25  ;;  %2345 = vmatmul.mubr.msk.bf16.gmra.mrb[60].mxu1 %vm569_vm0, %v488_v25  ;;  %v416_v25 = vmul.f32 %v3441_v36, %v380_v23 }
 0x13a   : > { %1196 = vmatprep.mubr.bf16.mxu0 %v3032_v0  ;;  %1389 = vmatprep.mubr.bf16.mxu1 %v3032_v0 }
 0x13b   : > { %v436_v26 = vpack.c.bf16 %v416_v25, %v415_v24 }
 0x141   : > { %1197 = vmatmul.mubr.bf16.vlgmr.msra.gmra.mrb[0].mxu0 %v425_v32  ;;  %1390 = vmatmul.mubr.bf16.vlgmr.msra.gmra.mrb[0].mxu1 %v425_v32  ;;  %v418_v32 = vmul.f32 %v3429_v29, %v382_v30 }
 0x142   : > { %1206 = vmatprep.mubr.bf16.mxu0 %v3032_v0  ;;  %1399 = vmatprep.mubr.bf16.mxu1 %v3032_v0 }
 0x143   : > { %v437_v33 = vpack.c.bf16 %v418_v32, %v417_v31 }
 0x149   : > { %1207 = vmatmul.mubr.bf16.gmra.mrb[4].mxu0 %v426_v39  ;;  %1400 = vmatmul.mubr.bf16.gmra.mrb[4].mxu1 %v426_v39  ;;  %v420_v39 = vmul.f32 %v3441_v36, %v384_v37 }
 0x14a   : > { %1216 = vmatprep.mubr.bf16.mxu0 %v3032_v0  ;;  %1409 = vmatprep.mubr.bf16.mxu1 %v3032_v0 }
 0x14b   : > { %v438_v40 = vpack.c.bf16 %v420_v39, %v419_v38 }
 0x151   : > { %1217 = vmatmul.mubr.bf16.gmra.mrb[8].mxu0 %v427_v44  ;;  %1410 = vmatmul.mubr.bf16.gmra.mrb[8].mxu1 %v427_v44  ;;  %v422_v44 = vmul.f32 %v3429_v29, %v386_v42  ;;  %v1552_v29 = vlaneseq }
 0x152   : > { %1226 = vmatprep.mubr.bf16.mxu0 %v3032_v0  ;;  %1419 = vmatprep.mubr.bf16.mxu1 %v3032_v0 }
 0x153   : > { %v439_v45 = vpack.c.bf16 %v422_v44, %v421_v43  ;;  %v1553_v50 = vshrl.u32 %v1552_v29, 7 }
 0x155   : > { %v1554_v51 = vsub.s32 0, %v1553_v50  ;;  %v1562_v52 = vsub.s32 2, %v1553_v50  ;;  %v1566_v35 = vsub.s32 3, %v1553_v50 }
 0x157   : > { %v3534_v55 = vrot.slane %v1550_v53, %v1554_v51 }
 0x159   : > { %1227 = vmatmul.mubr.bf16.gmra.mrb[12].mxu0 %v428_v49  ;;  %1420 = vmatmul.mubr.bf16.gmra.mrb[12].mxu1 %v428_v49  ;;  %v424_v49 = vmul.f32 %v3441_v36, %v388_v47  ;;  %v3536_v36 = vrot.slane %v1550_v53, %v1562_v52 }
 0x15a   : > { %1236 = vmatprep.mubr.bf16.mxu0 %v3032_v0  ;;  %1429 = vmatprep.mubr.bf16.mxu1 %v3032_v0 }
 0x15b   : > { %v440_v28 = vpack.c.bf16 %v424_v49, %v423_v48 }
 0x161   : > { %1237 = vmatmul.mubr.bf16.gmra.mrb[16].mxu0 %v429_v54  ;;  %1430 = vmatmul.mubr.bf16.gmra.mrb[16].mxu1 %v429_v54  ;;  %v1558_v54 = vsub.s32 1, %v1553_v50 }
 0x162   : > { %1246 = vmatprep.mubr.bf16.mxu0 %v3032_v0  ;;  %1439 = vmatprep.mubr.bf16.mxu1 %v3032_v0 }
 0x163   : > { %v3538_v56 = vrot.slane %v1550_v53, %v1558_v54 }
 0x169   : > { %1247 = vmatmul.mubr.bf16.gmra.mrb[20].mxu0 %v430_v59  ;;  %1440 = vmatmul.mubr.bf16.gmra.mrb[20].mxu1 %v430_v59 }
 0x16a   : > { %1256 = vmatprep.mubr.bf16.mxu0 %v3032_v0  ;;  %1449 = vmatprep.mubr.bf16.mxu1 %v3032_v0 }
 0x171   : > { %1257 = vmatmul.mubr.bf16.gmra.mrb[24].mxu0 %v431_v1  ;;  %1450 = vmatmul.mubr.bf16.gmra.mrb[24].mxu1 %v431_v1 }
 0x172   : > { %1266 = vmatprep.mubr.bf16.mxu0 %v3032_v0  ;;  %1459 = vmatprep.mubr.bf16.mxu1 %v3032_v0 }
 0x179   : > { %1267 = vmatmul.mubr.bf16.gmra.mrb[28].mxu0 %v432_v6  ;;  %1460 = vmatmul.mubr.bf16.gmra.mrb[28].mxu1 %v432_v6 }
 0x17a   : > { %1276 = vmatprep.mubr.bf16.mxu0 %v3032_v0  ;;  %1469 = vmatprep.mubr.bf16.mxu1 %v3032_v0 }
 0x181   : > { %1277 = vmatmul.mubr.bf16.gmra.mrb[32].mxu0 %v433_v11  ;;  %1470 = vmatmul.mubr.bf16.gmra.mrb[32].mxu1 %v433_v11 }
 0x182   : > { %1286 = vmatprep.mubr.bf16.mxu0 %v3032_v0  ;;  %1479 = vmatprep.mubr.bf16.mxu1 %v3032_v0 }
 0x189   : > { %1287 = vmatmul.mubr.bf16.gmra.mrb[36].mxu0 %v434_v16  ;;  %1480 = vmatmul.mubr.bf16.gmra.mrb[36].mxu1 %v434_v16 }
 0x18a   : > { %1296 = vmatprep.mubr.bf16.mxu0 %v3032_v0  ;;  %1489 = vmatprep.mubr.bf16.mxu1 %v3032_v0 }
 0x191   : > { %1297 = vmatmul.mubr.bf16.gmra.mrb[40].mxu0 %v435_v21  ;;  %1490 = vmatmul.mubr.bf16.gmra.mrb[40].mxu1 %v435_v21 }
 0x192   : > { %1306 = vmatprep.mubr.bf16.mxu0 %v3032_v0  ;;  %1499 = vmatprep.mubr.bf16.mxu1 %v3032_v0 }
 0x199   : > { %1307 = vmatmul.mubr.bf16.gmra.mrb[44].mxu0 %v436_v26  ;;  %1500 = vmatmul.mubr.bf16.gmra.mrb[44].mxu1 %v436_v26 }
 0x19a   : > { %1316 = vmatprep.mubr.bf16.mxu0 %v3032_v0  ;;  %1509 = vmatprep.mubr.bf16.mxu1 %v3032_v0 }
 0x1a1   : > { %1317 = vmatmul.mubr.bf16.gmra.mrb[48].mxu0 %v437_v33  ;;  %1510 = vmatmul.mubr.bf16.gmra.mrb[48].mxu1 %v437_v33 }
 0x1a2   : > { %1326 = vmatprep.mubr.bf16.mxu0 %v3032_v0  ;;  %1519 = vmatprep.mubr.bf16.mxu1 %v3032_v0 }
 0x1a9   : > { %1327 = vmatmul.mubr.bf16.gmra.mrb[52].mxu0 %v438_v40  ;;  %1520 = vmatmul.mubr.bf16.gmra.mrb[52].mxu1 %v438_v40 }
 0x1aa   : > { %1336 = vmatprep.mubr.bf16.mxu0 %v3032_v0  ;;  %1529 = vmatprep.mubr.bf16.mxu1 %v3032_v0 }
 0x1b1   : > { %1337 = vmatmul.mubr.bf16.gmra.mrb[56].mxu0 %v439_v45  ;;  %1530 = vmatmul.mubr.bf16.gmra.mrb[56].mxu1 %v439_v45 }
 0x1b2   : > { %1346 = vmatprep.mubr.bf16.mxu0 %v3032_v0  ;;  %1539 = vmatprep.mubr.bf16.mxu1 %v3032_v0  ;;  %v3540_v0 = vrot.slane %v1550_v53, %v1566_v35 }
 0x1b9   : > { %1347 = vmatmul.mubr.bf16.gmra.mrb[60].mxu0 %v440_v28  ;;  %1540 = vmatmul.mubr.bf16.gmra.mrb[60].mxu1 %v440_v28 }
 0x214   : > { %v1198_v57 = vpop.f32.mrb[0].mxu0  ;;  %v1391_v58 = vpop.f32.mrb[0].mxu1 }
 0x215   : > { %v1572_v59 = vadd.f32 %v3534_v55, %v1198_v57  ;;  %v1574_v60 = vadd.f32 %v3536_v36, %v1391_v58  ;;  %v1200_v61 = vpop.f32.mrb[1].mxu0  ;;  %v1393_v62 = vpop.f32.mrb[1].mxu1 }
 0x216   : > { %v1573_v63 = vadd.f32 %v3538_v56, %v1200_v61  ;;  %v1575_v1 = vadd.f32 %v3540_v0, %v1393_v62  ;;  %v1202_v2 = vpop.f32.mrb[2].mxu0  ;;  %v1395_v3 = vpop.f32.mrb[2].mxu1 }
 0x217   : > { %v1576_v4 = vadd.f32 %v3534_v55, %v1202_v2  ;;  %v1578_v5 = vadd.f32 %v3536_v36, %v1395_v3  ;;  %v1204_v6 = vpop.f32.mrb[3].mxu0  ;;  %v1397_v7 = vpop.f32.mrb[3].mxu1 }
 0x218   : > { %v2452_v8 = vpack.c.bf16 %v1573_v63, %v1572_v59  ;;  %v2453_v9 = vpack.c.bf16 %v1575_v1, %v1574_v60  ;;  %v1577_v10 = vadd.f32 %v3538_v56, %v1204_v6  ;;  %v1579_v11 = vadd.f32 %v3540_v0, %v1397_v7 }
 0x21a   : > { %2084 = vst [vmem:[%s3551_s7] sm:$0xff] %v2452_v8  ;;  %2085 = vst [vmem:[%s3551_s7 + $0x8] sm:$0xff] %v2453_v9  ;;  %v2454_v12 = vpack.c.bf16 %v1577_v10, %v1576_v4  ;;  %v2455_v13 = vpack.c.bf16 %v1579_v11, %v1578_v5 }
 0x21c   : > { %2086 = vst [vmem:[%s3551_s7 + $0x10] sm:$0xff] %v2454_v12  ;;  %2087 = vst [vmem:[%s3551_s7 + $0x18] sm:$0xff] %v2455_v13  ;;  %v1208_v14 = vpop.f32.mrb[4].mxu0  ;;  %v1401_v15 = vpop.f32.mrb[4].mxu1 }
 0x21d   : > { %v1580_v16 = vadd.f32 %v3534_v55, %v1208_v14  ;;  %v1582_v17 = vadd.f32 %v3536_v36, %v1401_v15  ;;  %v1210_v18 = vpop.f32.mrb[5].mxu0  ;;  %v1403_v19 = vpop.f32.mrb[5].mxu1 }
 0x21e   : > { %v1581_v20 = vadd.f32 %v3538_v56, %v1210_v18  ;;  %v1583_v21 = vadd.f32 %v3540_v0, %v1403_v19  ;;  %v1212_v22 = vpop.f32.mrb[6].mxu0  ;;  %v1405_v23 = vpop.f32.mrb[6].mxu1 }
 0x21f   : > { %v1584_v24 = vadd.f32 %v3534_v55, %v1212_v22  ;;  %v1586_v25 = vadd.f32 %v3536_v36, %v1405_v23  ;;  %v1214_v26 = vpop.f32.mrb[7].mxu0  ;;  %v1407_v27 = vpop.f32.mrb[7].mxu1 }
 0x220   : > { %v2456_v30 = vpack.c.bf16 %v1581_v20, %v1580_v16  ;;  %v2457_v31 = vpack.c.bf16 %v1583_v21, %v1582_v17  ;;  %v1585_v32 = vadd.f32 %v3538_v56, %v1214_v26  ;;  %v1587_v33 = vadd.f32 %v3540_v0, %v1407_v27 }
 0x222   : > { %2088 = vst [vmem:[%s3551_s7 + $0x20] sm:$0xff] %v2456_v30  ;;  %2089 = vst [vmem:[%s3551_s7 + $0x28] sm:$0xff] %v2457_v31  ;;  %v2458_v34 = vpack.c.bf16 %v1585_v32, %v1584_v24  ;;  %v2459_v37 = vpack.c.bf16 %v1587_v33, %v1586_v25 }
 0x224   : > { %2090 = vst [vmem:[%s3551_s7 + $0x30] sm:$0xff] %v2458_v34  ;;  %2091 = vst [vmem:[%s3551_s7 + $0x38] sm:$0xff] %v2459_v37  ;;  %v1218_v38 = vpop.f32.mrb[8].mxu0  ;;  %v1411_v39 = vpop.f32.mrb[8].mxu1 }
 0x225   : > { %v1588_v40 = vadd.f32 %v3534_v55, %v1218_v38  ;;  %v1590_v41 = vadd.f32 %v3536_v36, %v1411_v39  ;;  %v1220_v42 = vpop.f32.mrb[9].mxu0  ;;  %v1413_v43 = vpop.f32.mrb[9].mxu1 }
 0x226   : > { %v1589_v44 = vadd.f32 %v3538_v56, %v1220_v42  ;;  %v1591_v45 = vadd.f32 %v3540_v0, %v1413_v43  ;;  %v1222_v46 = vpop.f32.mrb[10].mxu0  ;;  %v1415_v47 = vpop.f32.mrb[10].mxu1 }
 0x227   : > { %v1592_v48 = vadd.f32 %v3534_v55, %v1222_v46  ;;  %v1594_v49 = vadd.f32 %v3536_v36, %v1415_v47  ;;  %v1224_v28 = vpop.f32.mrb[11].mxu0  ;;  %v1417_v29 = vpop.f32.mrb[11].mxu1 }
 0x228   : > { %v2460_v50 = vpack.c.bf16 %v1589_v44, %v1588_v40  ;;  %v2461_v51 = vpack.c.bf16 %v1591_v45, %v1590_v41  ;;  %v1593_v52 = vadd.f32 %v3538_v56, %v1224_v28  ;;  %v1595_v53 = vadd.f32 %v3540_v0, %v1417_v29 }
 0x22a   : > { %2092 = vst [vmem:[%s3551_s7 + $0x40] sm:$0xff] %v2460_v50  ;;  %2093 = vst [vmem:[%s3551_s7 + $0x48] sm:$0xff] %v2461_v51  ;;  %v2462_v54 = vpack.c.bf16 %v1593_v52, %v1592_v48  ;;  %v2463_v35 = vpack.c.bf16 %v1595_v53, %v1594_v49 }
 0x22c   : > { %2094 = vst [vmem:[%s3551_s7 + $0x50] sm:$0xff] %v2462_v54  ;;  %2095 = vst [vmem:[%s3551_s7 + $0x58] sm:$0xff] %v2463_v35  ;;  %v1228_v57 = vpop.f32.mrb[12].mxu0  ;;  %v1421_v58 = vpop.f32.mrb[12].mxu1 }
 0x22d   : > { %v1596_v59 = vadd.f32 %v3534_v55, %v1228_v57  ;;  %v1598_v60 = vadd.f32 %v3536_v36, %v1421_v58  ;;  %v1230_v61 = vpop.f32.mrb[13].mxu0  ;;  %v1423_v62 = vpop.f32.mrb[13].mxu1 }
 0x22e   : > { %v1597_v63 = vadd.f32 %v3538_v56, %v1230_v61  ;;  %v1599_v1 = vadd.f32 %v3540_v0, %v1423_v62  ;;  %v1232_v2 = vpop.f32.mrb[14].mxu0  ;;  %v1425_v3 = vpop.f32.mrb[14].mxu1 }
 0x22f   : > { %v1600_v4 = vadd.f32 %v3534_v55, %v1232_v2  ;;  %v1602_v5 = vadd.f32 %v3536_v36, %v1425_v3  ;;  %v1234_v6 = vpop.f32.mrb[15].mxu0  ;;  %v1427_v7 = vpop.f32.mrb[15].mxu1 }
 0x230   : > { %v2464_v8 = vpack.c.bf16 %v1597_v63, %v1596_v59  ;;  %v2465_v9 = vpack.c.bf16 %v1599_v1, %v1598_v60  ;;  %v1601_v10 = vadd.f32 %v3538_v56, %v1234_v6  ;;  %v1603_v11 = vadd.f32 %v3540_v0, %v1427_v7 }
 0x232   : > { %2096 = vst [vmem:[%s3551_s7 + $0x60] sm:$0xff] %v2464_v8  ;;  %2097 = vst [vmem:[%s3551_s7 + $0x68] sm:$0xff] %v2465_v9  ;;  %v2466_v12 = vpack.c.bf16 %v1601_v10, %v1600_v4  ;;  %v2467_v13 = vpack.c.bf16 %v1603_v11, %v1602_v5 }
 0x234   : > { %2098 = vst [vmem:[%s3551_s7 + $0x70] sm:$0xff] %v2466_v12  ;;  %2099 = vst [vmem:[%s3551_s7 + $0x78] sm:$0xff] %v2467_v13  ;;  %v1238_v14 = vpop.f32.mrb[16].mxu0  ;;  %v1431_v15 = vpop.f32.mrb[16].mxu1 }
 0x235   : > { %v1604_v16 = vadd.f32 %v3534_v55, %v1238_v14  ;;  %v1606_v17 = vadd.f32 %v3536_v36, %v1431_v15  ;;  %v1240_v18 = vpop.f32.mrb[17].mxu0  ;;  %v1433_v19 = vpop.f32.mrb[17].mxu1 }
 0x236   : > { %v1605_v20 = vadd.f32 %v3538_v56, %v1240_v18  ;;  %v1607_v21 = vadd.f32 %v3540_v0, %v1433_v19  ;;  %v1242_v22 = vpop.f32.mrb[18].mxu0  ;;  %v1435_v23 = vpop.f32.mrb[18].mxu1 }
 0x237   : > { %v1608_v24 = vadd.f32 %v3534_v55, %v1242_v22  ;;  %v1610_v25 = vadd.f32 %v3536_v36, %v1435_v23  ;;  %v1244_v26 = vpop.f32.mrb[19].mxu0  ;;  %v1437_v27 = vpop.f32.mrb[19].mxu1 }
 0x238   : > { %v2468_v30 = vpack.c.bf16 %v1605_v20, %v1604_v16  ;;  %v2469_v31 = vpack.c.bf16 %v1607_v21, %v1606_v17  ;;  %v1609_v32 = vadd.f32 %v3538_v56, %v1244_v26  ;;  %v1611_v33 = vadd.f32 %v3540_v0, %v1437_v27 }
 0x23a   : > { %2100 = vst [vmem:[%s3551_s7 + $0x80] sm:$0xff] %v2468_v30  ;;  %2101 = vst [vmem:[%s3551_s7 + $0x88] sm:$0xff] %v2469_v31  ;;  %v2470_v34 = vpack.c.bf16 %v1609_v32, %v1608_v24  ;;  %v2471_v37 = vpack.c.bf16 %v1611_v33, %v1610_v25 }
 0x23c   : > { %2102 = vst [vmem:[%s3551_s7 + $0x90] sm:$0xff] %v2470_v34  ;;  %2103 = vst [vmem:[%s3551_s7 + $0x98] sm:$0xff] %v2471_v37  ;;  %v1248_v38 = vpop.f32.mrb[20].mxu0  ;;  %v1441_v39 = vpop.f32.mrb[20].mxu1 }
 0x23d   : > { %v1612_v40 = vadd.f32 %v3534_v55, %v1248_v38  ;;  %v1614_v41 = vadd.f32 %v3536_v36, %v1441_v39  ;;  %v1250_v42 = vpop.f32.mrb[21].mxu0  ;;  %v1443_v43 = vpop.f32.mrb[21].mxu1 }
 0x23e   : > { %v1613_v44 = vadd.f32 %v3538_v56, %v1250_v42  ;;  %v1615_v45 = vadd.f32 %v3540_v0, %v1443_v43  ;;  %v1252_v46 = vpop.f32.mrb[22].mxu0  ;;  %v1445_v47 = vpop.f32.mrb[22].mxu1 }
 0x23f   : > { %v1616_v48 = vadd.f32 %v3534_v55, %v1252_v46  ;;  %v1618_v49 = vadd.f32 %v3536_v36, %v1445_v47  ;;  %v1254_v28 = vpop.f32.mrb[23].mxu0  ;;  %v1447_v29 = vpop.f32.mrb[23].mxu1 }
 0x240   : > { %v2472_v50 = vpack.c.bf16 %v1613_v44, %v1612_v40  ;;  %v2473_v51 = vpack.c.bf16 %v1615_v45, %v1614_v41  ;;  %v1617_v52 = vadd.f32 %v3538_v56, %v1254_v28  ;;  %v1619_v53 = vadd.f32 %v3540_v0, %v1447_v29 }
 0x242   : > { %2104 = vst [vmem:[%s3551_s7 + $0xa0] sm:$0xff] %v2472_v50  ;;  %2105 = vst [vmem:[%s3551_s7 + $0xa8] sm:$0xff] %v2473_v51  ;;  %v2474_v54 = vpack.c.bf16 %v1617_v52, %v1616_v48  ;;  %v2475_v35 = vpack.c.bf16 %v1619_v53, %v1618_v49 }
 0x244   : > { %2106 = vst [vmem:[%s3551_s7 + $0xb0] sm:$0xff] %v2474_v54  ;;  %2107 = vst [vmem:[%s3551_s7 + $0xb8] sm:$0xff] %v2475_v35  ;;  %v1258_v57 = vpop.f32.mrb[24].mxu0  ;;  %v1451_v58 = vpop.f32.mrb[24].mxu1 }
 0x245   : > { %v1620_v59 = vadd.f32 %v3534_v55, %v1258_v57  ;;  %v1622_v60 = vadd.f32 %v3536_v36, %v1451_v58  ;;  %v1260_v61 = vpop.f32.mrb[25].mxu0  ;;  %v1453_v62 = vpop.f32.mrb[25].mxu1 }
 0x246   : > { %v1621_v63 = vadd.f32 %v3538_v56, %v1260_v61  ;;  %v1623_v1 = vadd.f32 %v3540_v0, %v1453_v62  ;;  %v1262_v2 = vpop.f32.mrb[26].mxu0  ;;  %v1455_v3 = vpop.f32.mrb[26].mxu1 }
 0x247   : > { %v1624_v4 = vadd.f32 %v3534_v55, %v1262_v2  ;;  %v1626_v5 = vadd.f32 %v3536_v36, %v1455_v3  ;;  %v1264_v6 = vpop.f32.mrb[27].mxu0  ;;  %v1457_v7 = vpop.f32.mrb[27].mxu1 }
 0x248   : > { %v2476_v8 = vpack.c.bf16 %v1621_v63, %v1620_v59  ;;  %v2477_v9 = vpack.c.bf16 %v1623_v1, %v1622_v60  ;;  %v1625_v10 = vadd.f32 %v3538_v56, %v1264_v6  ;;  %v1627_v11 = vadd.f32 %v3540_v0, %v1457_v7 }
 0x24a   : > { %2108 = vst [vmem:[%s3551_s7 + $0xc0] sm:$0xff] %v2476_v8  ;;  %2109 = vst [vmem:[%s3551_s7 + $0xc8] sm:$0xff] %v2477_v9  ;;  %v2478_v12 = vpack.c.bf16 %v1625_v10, %v1624_v4  ;;  %v2479_v13 = vpack.c.bf16 %v1627_v11, %v1626_v5 }
 0x24c   : > { %2110 = vst [vmem:[%s3551_s7 + $0xd0] sm:$0xff] %v2478_v12  ;;  %2111 = vst [vmem:[%s3551_s7 + $0xd8] sm:$0xff] %v2479_v13  ;;  %v1268_v14 = vpop.f32.mrb[28].mxu0  ;;  %v1461_v15 = vpop.f32.mrb[28].mxu1 }
 0x24d   : > { %v1628_v16 = vadd.f32 %v3534_v55, %v1268_v14  ;;  %v1630_v17 = vadd.f32 %v3536_v36, %v1461_v15  ;;  %v1270_v18 = vpop.f32.mrb[29].mxu0  ;;  %v1463_v19 = vpop.f32.mrb[29].mxu1 }
 0x24e   : > { %v1629_v20 = vadd.f32 %v3538_v56, %v1270_v18  ;;  %v1631_v21 = vadd.f32 %v3540_v0, %v1463_v19  ;;  %v1272_v22 = vpop.f32.mrb[30].mxu0  ;;  %v1465_v23 = vpop.f32.mrb[30].mxu1 }
 0x24f   : > { %v1632_v24 = vadd.f32 %v3534_v55, %v1272_v22  ;;  %v1634_v25 = vadd.f32 %v3536_v36, %v1465_v23  ;;  %v1274_v26 = vpop.f32.mrb[31].mxu0  ;;  %v1467_v27 = vpop.f32.mrb[31].mxu1 }
 0x250   : > { %v2480_v30 = vpack.c.bf16 %v1629_v20, %v1628_v16  ;;  %v2481_v31 = vpack.c.bf16 %v1631_v21, %v1630_v17  ;;  %v1633_v32 = vadd.f32 %v3538_v56, %v1274_v26  ;;  %v1635_v33 = vadd.f32 %v3540_v0, %v1467_v27 }
 0x252   : > { %2112 = vst [vmem:[%s3551_s7 + $0xe0] sm:$0xff] %v2480_v30  ;;  %2113 = vst [vmem:[%s3551_s7 + $0xe8] sm:$0xff] %v2481_v31  ;;  %v2482_v34 = vpack.c.bf16 %v1633_v32, %v1632_v24  ;;  %v2483_v37 = vpack.c.bf16 %v1635_v33, %v1634_v25 }
 0x254   : > { %2114 = vst [vmem:[%s3551_s7 + $0xf0] sm:$0xff] %v2482_v34  ;;  %2115 = vst [vmem:[%s3551_s7 + $0xf8] sm:$0xff] %v2483_v37  ;;  %v1278_v38 = vpop.f32.mrb[32].mxu0  ;;  %v1471_v39 = vpop.f32.mrb[32].mxu1 }
 0x255   : > { %v1636_v40 = vadd.f32 %v3534_v55, %v1278_v38  ;;  %v1638_v41 = vadd.f32 %v3536_v36, %v1471_v39  ;;  %v1280_v42 = vpop.f32.mrb[33].mxu0  ;;  %v1473_v43 = vpop.f32.mrb[33].mxu1 }
 0x256   : > { %v1637_v44 = vadd.f32 %v3538_v56, %v1280_v42  ;;  %v1639_v45 = vadd.f32 %v3540_v0, %v1473_v43  ;;  %v1282_v46 = vpop.f32.mrb[34].mxu0  ;;  %v1475_v47 = vpop.f32.mrb[34].mxu1 }
 0x257   : > { %v1640_v48 = vadd.f32 %v3534_v55, %v1282_v46  ;;  %v1642_v49 = vadd.f32 %v3536_v36, %v1475_v47  ;;  %v1284_v28 = vpop.f32.mrb[35].mxu0  ;;  %v1477_v29 = vpop.f32.mrb[35].mxu1 }
 0x258   : > { %v2484_v50 = vpack.c.bf16 %v1637_v44, %v1636_v40  ;;  %v2485_v51 = vpack.c.bf16 %v1639_v45, %v1638_v41  ;;  %v1641_v52 = vadd.f32 %v3538_v56, %v1284_v28  ;;  %v1643_v53 = vadd.f32 %v3540_v0, %v1477_v29 }
 0x25a   : > { %2116 = vst [vmem:[%s3551_s7 + $0x100] sm:$0xff] %v2484_v50  ;;  %2117 = vst [vmem:[%s3551_s7 + $0x108] sm:$0xff] %v2485_v51  ;;  %v2486_v54 = vpack.c.bf16 %v1641_v52, %v1640_v48  ;;  %v2487_v35 = vpack.c.bf16 %v1643_v53, %v1642_v49 }
 0x25c   : > { %2118 = vst [vmem:[%s3551_s7 + $0x110] sm:$0xff] %v2486_v54  ;;  %2119 = vst [vmem:[%s3551_s7 + $0x118] sm:$0xff] %v2487_v35  ;;  %v1288_v57 = vpop.f32.mrb[36].mxu0  ;;  %v1481_v58 = vpop.f32.mrb[36].mxu1 }
 0x25d   : > { %v1644_v59 = vadd.f32 %v3534_v55, %v1288_v57  ;;  %v1646_v60 = vadd.f32 %v3536_v36, %v1481_v58  ;;  %v1290_v61 = vpop.f32.mrb[37].mxu0  ;;  %v1483_v62 = vpop.f32.mrb[37].mxu1 }
 0x25e   : > { %v1645_v63 = vadd.f32 %v3538_v56, %v1290_v61  ;;  %v1647_v1 = vadd.f32 %v3540_v0, %v1483_v62  ;;  %v1292_v2 = vpop.f32.mrb[38].mxu0  ;;  %v1485_v3 = vpop.f32.mrb[38].mxu1 }
 0x25f   : > { %v1648_v4 = vadd.f32 %v3534_v55, %v1292_v2  ;;  %v1650_v5 = vadd.f32 %v3536_v36, %v1485_v3  ;;  %v1294_v6 = vpop.f32.mrb[39].mxu0  ;;  %v1487_v7 = vpop.f32.mrb[39].mxu1 }
 0x260   : > { %v2488_v8 = vpack.c.bf16 %v1645_v63, %v1644_v59  ;;  %v2489_v9 = vpack.c.bf16 %v1647_v1, %v1646_v60  ;;  %v1649_v10 = vadd.f32 %v3538_v56, %v1294_v6  ;;  %v1651_v11 = vadd.f32 %v3540_v0, %v1487_v7 }
 0x262   : > { %2120 = vst [vmem:[%s3551_s7 + $0x120] sm:$0xff] %v2488_v8  ;;  %2121 = vst [vmem:[%s3551_s7 + $0x128] sm:$0xff] %v2489_v9  ;;  %v2490_v12 = vpack.c.bf16 %v1649_v10, %v1648_v4  ;;  %v2491_v13 = vpack.c.bf16 %v1651_v11, %v1650_v5 }
 0x264   : > { %2122 = vst [vmem:[%s3551_s7 + $0x130] sm:$0xff] %v2490_v12  ;;  %2123 = vst [vmem:[%s3551_s7 + $0x138] sm:$0xff] %v2491_v13  ;;  %v1298_v14 = vpop.f32.mrb[40].mxu0  ;;  %v1491_v15 = vpop.f32.mrb[40].mxu1 }
 0x265   : > { %v1652_v16 = vadd.f32 %v3534_v55, %v1298_v14  ;;  %v1654_v17 = vadd.f32 %v3536_v36, %v1491_v15  ;;  %v1300_v18 = vpop.f32.mrb[41].mxu0  ;;  %v1493_v19 = vpop.f32.mrb[41].mxu1 }
 0x266   : > { %v1653_v20 = vadd.f32 %v3538_v56, %v1300_v18  ;;  %v1655_v21 = vadd.f32 %v3540_v0, %v1493_v19  ;;  %v1302_v22 = vpop.f32.mrb[42].mxu0  ;;  %v1495_v23 = vpop.f32.mrb[42].mxu1 }
 0x267   : > { %v1656_v24 = vadd.f32 %v3534_v55, %v1302_v22  ;;  %v1658_v25 = vadd.f32 %v3536_v36, %v1495_v23  ;;  %v1304_v26 = vpop.f32.mrb[43].mxu0  ;;  %v1497_v27 = vpop.f32.mrb[43].mxu1 }
 0x268   : > { %v2492_v30 = vpack.c.bf16 %v1653_v20, %v1652_v16  ;;  %v2493_v31 = vpack.c.bf16 %v1655_v21, %v1654_v17  ;;  %v1657_v32 = vadd.f32 %v3538_v56, %v1304_v26  ;;  %v1659_v33 = vadd.f32 %v3540_v0, %v1497_v27 }
 0x26a   : > { %2124 = vst [vmem:[%s3551_s7 + $0x140] sm:$0xff] %v2492_v30  ;;  %2125 = vst [vmem:[%s3551_s7 + $0x148] sm:$0xff] %v2493_v31  ;;  %v2494_v34 = vpack.c.bf16 %v1657_v32, %v1656_v24  ;;  %v2495_v37 = vpack.c.bf16 %v1659_v33, %v1658_v25 }
 0x26c   : > { %2126 = vst [vmem:[%s3551_s7 + $0x150] sm:$0xff] %v2494_v34  ;;  %2127 = vst [vmem:[%s3551_s7 + $0x158] sm:$0xff] %v2495_v37  ;;  %v1308_v38 = vpop.f32.mrb[44].mxu0  ;;  %v1501_v39 = vpop.f32.mrb[44].mxu1 }
 0x26d   : > { %v1660_v40 = vadd.f32 %v3534_v55, %v1308_v38  ;;  %v1662_v41 = vadd.f32 %v3536_v36, %v1501_v39  ;;  %v1310_v42 = vpop.f32.mrb[45].mxu0  ;;  %v1503_v43 = vpop.f32.mrb[45].mxu1 }
 0x26e   : > { %v1661_v44 = vadd.f32 %v3538_v56, %v1310_v42  ;;  %v1663_v45 = vadd.f32 %v3540_v0, %v1503_v43  ;;  %v1312_v46 = vpop.f32.mrb[46].mxu0  ;;  %v1505_v47 = vpop.f32.mrb[46].mxu1 }
 0x26f   : > { %v1664_v48 = vadd.f32 %v3534_v55, %v1312_v46  ;;  %v1666_v49 = vadd.f32 %v3536_v36, %v1505_v47  ;;  %v1314_v28 = vpop.f32.mrb[47].mxu0  ;;  %v1507_v29 = vpop.f32.mrb[47].mxu1 }
 0x270   : > { %v2496_v50 = vpack.c.bf16 %v1661_v44, %v1660_v40  ;;  %v2497_v51 = vpack.c.bf16 %v1663_v45, %v1662_v41  ;;  %v1665_v52 = vadd.f32 %v3538_v56, %v1314_v28  ;;  %v1667_v53 = vadd.f32 %v3540_v0, %v1507_v29 }
 0x272   : > { %2128 = vst [vmem:[%s3551_s7 + $0x160] sm:$0xff] %v2496_v50  ;;  %2129 = vst [vmem:[%s3551_s7 + $0x168] sm:$0xff] %v2497_v51  ;;  %v2498_v54 = vpack.c.bf16 %v1665_v52, %v1664_v48  ;;  %v2499_v35 = vpack.c.bf16 %v1667_v53, %v1666_v49 }
 0x274   : > { %2130 = vst [vmem:[%s3551_s7 + $0x170] sm:$0xff] %v2498_v54  ;;  %2131 = vst [vmem:[%s3551_s7 + $0x178] sm:$0xff] %v2499_v35  ;;  %v1318_v57 = vpop.f32.mrb[48].mxu0  ;;  %v1511_v58 = vpop.f32.mrb[48].mxu1 }
 0x275   : > { %v1668_v59 = vadd.f32 %v3534_v55, %v1318_v57  ;;  %v1670_v60 = vadd.f32 %v3536_v36, %v1511_v58  ;;  %v1320_v61 = vpop.f32.mrb[49].mxu0  ;;  %v1513_v62 = vpop.f32.mrb[49].mxu1 }
 0x276   : > { %v1669_v63 = vadd.f32 %v3538_v56, %v1320_v61  ;;  %v1671_v1 = vadd.f32 %v3540_v0, %v1513_v62  ;;  %v1322_v2 = vpop.f32.mrb[50].mxu0  ;;  %v1515_v3 = vpop.f32.mrb[50].mxu1 }
 0x277   : > { %v1672_v4 = vadd.f32 %v3534_v55, %v1322_v2  ;;  %v1674_v5 = vadd.f32 %v3536_v36, %v1515_v3  ;;  %v1324_v6 = vpop.f32.mrb[51].mxu0  ;;  %v1517_v7 = vpop.f32.mrb[51].mxu1 }
 0x278   : > { %v2500_v8 = vpack.c.bf16 %v1669_v63, %v1668_v59  ;;  %v2501_v9 = vpack.c.bf16 %v1671_v1, %v1670_v60  ;;  %v1673_v10 = vadd.f32 %v3538_v56, %v1324_v6  ;;  %v1675_v11 = vadd.f32 %v3540_v0, %v1517_v7 }
 0x27a   : > { %2132 = vst [vmem:[%s3551_s7 + $0x180] sm:$0xff] %v2500_v8  ;;  %2133 = vst [vmem:[%s3551_s7 + $0x188] sm:$0xff] %v2501_v9  ;;  %v2502_v12 = vpack.c.bf16 %v1673_v10, %v1672_v4  ;;  %v2503_v13 = vpack.c.bf16 %v1675_v11, %v1674_v5 }
 0x27c   : > { %2134 = vst [vmem:[%s3551_s7 + $0x190] sm:$0xff] %v2502_v12  ;;  %2135 = vst [vmem:[%s3551_s7 + $0x198] sm:$0xff] %v2503_v13  ;;  %v1328_v14 = vpop.f32.mrb[52].mxu0  ;;  %v1521_v15 = vpop.f32.mrb[52].mxu1 }
 0x27d   : > { %v1676_v16 = vadd.f32 %v3534_v55, %v1328_v14  ;;  %v1678_v17 = vadd.f32 %v3536_v36, %v1521_v15  ;;  %v1330_v18 = vpop.f32.mrb[53].mxu0  ;;  %v1523_v19 = vpop.f32.mrb[53].mxu1 }
 0x27e   : > { %v1677_v20 = vadd.f32 %v3538_v56, %v1330_v18  ;;  %v1679_v21 = vadd.f32 %v3540_v0, %v1523_v19  ;;  %v1332_v22 = vpop.f32.mrb[54].mxu0  ;;  %v1525_v23 = vpop.f32.mrb[54].mxu1 }
 0x27f   : > { %v1680_v24 = vadd.f32 %v3534_v55, %v1332_v22  ;;  %v1682_v25 = vadd.f32 %v3536_v36, %v1525_v23  ;;  %v1334_v26 = vpop.f32.mrb[55].mxu0  ;;  %v1527_v27 = vpop.f32.mrb[55].mxu1 }
 0x280   : > { %v2504_v30 = vpack.c.bf16 %v1677_v20, %v1676_v16  ;;  %v2505_v31 = vpack.c.bf16 %v1679_v21, %v1678_v17  ;;  %v1681_v32 = vadd.f32 %v3538_v56, %v1334_v26  ;;  %v1683_v33 = vadd.f32 %v3540_v0, %v1527_v27 }
 0x282   : > { %2136 = vst [vmem:[%s3551_s7 + $0x1a0] sm:$0xff] %v2504_v30  ;;  %2137 = vst [vmem:[%s3551_s7 + $0x1a8] sm:$0xff] %v2505_v31  ;;  %v2506_v34 = vpack.c.bf16 %v1681_v32, %v1680_v24  ;;  %v2507_v37 = vpack.c.bf16 %v1683_v33, %v1682_v25 }
 0x284   : > { %2138 = vst [vmem:[%s3551_s7 + $0x1b0] sm:$0xff] %v2506_v34  ;;  %2139 = vst [vmem:[%s3551_s7 + $0x1b8] sm:$0xff] %v2507_v37  ;;  %v1338_v38 = vpop.f32.mrb[56].mxu0  ;;  %v1531_v39 = vpop.f32.mrb[56].mxu1 }
 0x285   : > { %v1684_v40 = vadd.f32 %v3534_v55, %v1338_v38  ;;  %v1686_v41 = vadd.f32 %v3536_v36, %v1531_v39  ;;  %v1340_v42 = vpop.f32.mrb[57].mxu0  ;;  %v1533_v43 = vpop.f32.mrb[57].mxu1 }
 0x286   : > { %v1685_v44 = vadd.f32 %v3538_v56, %v1340_v42  ;;  %v1687_v45 = vadd.f32 %v3540_v0, %v1533_v43  ;;  %v1342_v46 = vpop.f32.mrb[58].mxu0  ;;  %v1535_v47 = vpop.f32.mrb[58].mxu1 }
 0x287   : > { %v1688_v48 = vadd.f32 %v3534_v55, %v1342_v46  ;;  %v1690_v49 = vadd.f32 %v3536_v36, %v1535_v47  ;;  %v1344_v28 = vpop.f32.mrb[59].mxu0  ;;  %v1537_v29 = vpop.f32.mrb[59].mxu1 }
 0x288   : > { %v2508_v50 = vpack.c.bf16 %v1685_v44, %v1684_v40  ;;  %v2509_v51 = vpack.c.bf16 %v1687_v45, %v1686_v41  ;;  %v1689_v52 = vadd.f32 %v3538_v56, %v1344_v28  ;;  %v1691_v53 = vadd.f32 %v3540_v0, %v1537_v29 }
 0x28a   : > { %2140 = vst [vmem:[%s3551_s7 + $0x1c0] sm:$0xff] %v2508_v50  ;;  %2141 = vst [vmem:[%s3551_s7 + $0x1c8] sm:$0xff] %v2509_v51  ;;  %v2510_v54 = vpack.c.bf16 %v1689_v52, %v1688_v48  ;;  %v2511_v35 = vpack.c.bf16 %v1691_v53, %v1690_v49 }
 0x28c   : > { %2142 = vst [vmem:[%s3551_s7 + $0x1d0] sm:$0xff] %v2510_v54  ;;  %2143 = vst [vmem:[%s3551_s7 + $0x1d8] sm:$0xff] %v2511_v35  ;;  %v1348_v57 = vpop.f32.mrb[60].mxu0  ;;  %v1541_v58 = vpop.f32.mrb[60].mxu1 }
 0x28d   : > { %v1692_v59 = vadd.f32 %v3534_v55, %v1348_v57  ;;  %v1694_v60 = vadd.f32 %v3536_v36, %v1541_v58  ;;  %v1350_v61 = vpop.f32.mrb[61].mxu0  ;;  %v1543_v62 = vpop.f32.mrb[61].mxu1 }
 0x28e   : > { %v1693_v63 = vadd.f32 %v3538_v56, %v1350_v61  ;;  %v1695_v1 = vadd.f32 %v3540_v0, %v1543_v62  ;;  %v1352_v2 = vpop.f32.mrb[62].mxu0  ;;  %v1545_v3 = vpop.f32.mrb[62].mxu1 }
 0x28f   : > { %v1696_v4 = vadd.f32 %v3534_v55, %v1352_v2  ;;  %v1698_v5 = vadd.f32 %v3536_v36, %v1545_v3  ;;  %v1354_v6 = vpop.f32.mrb[63].mxu0  ;;  %v1547_v7 = vpop.f32.mrb[63].mxu1 }
 0x290   : > { %v2512_v8 = vpack.c.bf16 %v1693_v63, %v1692_v59  ;;  %v2513_v9 = vpack.c.bf16 %v1695_v1, %v1694_v60  ;;  %v1697_v10 = vadd.f32 %v3538_v56, %v1354_v6  ;;  %v1699_v11 = vadd.f32 %v3540_v0, %v1547_v7 }
 0x292   : > { %2144 = vst [vmem:[%s3551_s7 + $0x1e0] sm:$0xff] %v2512_v8  ;;  %2145 = vst [vmem:[%s3551_s7 + $0x1e8] sm:$0xff] %v2513_v9  ;;  %v2514_v55 = vpack.c.bf16 %v1697_v10, %v1696_v4  ;;  %v2515_v36 = vpack.c.bf16 %v1699_v11, %v1698_v5 }
 0x294   : > { %2146 = vst [vmem:[%s3551_s7 + $0x1f0] sm:$0xff] %v2514_v55  ;;  %2147 = vst [vmem:[%s3551_s7 + $0x1f8] sm:$0xff] %v2515_v36 }
 0x295   : > { %2952 = shalt.err (!%p2949_p5)
}
 0x296   : > { %s2953_s23 = scalar_lea.hbm %s3738_s17, 8192  ;;  %s2957_s1 = scalar_lea.hbm %s3854_s25, 16384 }
 0x297   : > { %p2954_p13 = scmp.ne.s32.totalorder %s3738_s17, %s2953_s23  ;;  %p2958_p6 = scmp.lt.u32.totalorder %s3738_s17, %s3854_s25 }
 0x298   : > { %p2959_p4 = scmp.lt.u32.totalorder %s2957_s1, %s2953_s23  ;;  %p2961_p3 = scmp.lt.u32.totalorder %s2953_s23, %s3738_s17 }
 0x299   : > { %p2955_p12 = pnand %p2954_p13, %p3855_p0 }
 0x29a   : > { %p2960_p10 = por %p2959_p4, %p2958_p6 }
 0x29b   : > { %p2956_p1 = pneg %p2955_p12 }
 0x29c   : > { %p2962_p8 = por %p2961_p3, %p2960_p10 }
 0x29e   : > { %p2963_p11 = pnand %p2962_p8, %p2956_p1 }
 0x2a0   : > { %2966 = shalt.err (!%p2963_p11)
}
 0x2a1   : > { %s3034_s26 = smov 256   ;;  %s3035_s29 = smov 16  }
 0x2a2   : > { %2662 = dma.vmem_to_hbm [thread:$0]  (%p3855_p0), %s3740_s28, 8192, %s3738_s17, %s2149_s9, %s3034_s26, %s3034_s26, %s3035_s29  }
 0x2a3 PF: > { %s3856_s27 = sld [smem:[#allocation18_spill]]  ;;  %s3857_s18 = sld [smem:[#allocation20_spill]] }
 0x2a4   : > { %p3859_p2 = scmp.ge.s32.totalorder %s3021_s24, 2 }
 0x2a9   : > { %s2178_s30 = sand.u32 1, %s3856_s27   ;;  %p3858_p9 = scmp.ne.s32.totalorder %s3857_s18, 0 }
 0x2aa   : > { %s2179_s20 = scalar_lea.sflag [#allocation4], %s2178_s30 }
 0x2ab   : > { %p2682_p7 = pnand %p3859_p2, %p3858_p9 }
 0x2ad   : > { %3004 = dma.done.wait (!%p2682_p7), %s2179_s20, 8192  }
 0x2ae   : > { %3006 = vsyncadd (!%p2682_p7), %s2179_s20, 4294959104  ;;  %s3860_s24 = sld [smem:[#allocation21_spill]]  ;;  %s3861_s7 = sld [smem:[#allocation19_spill]] }
 0x2af   : > { %s3862_s23 = sld [smem:[#allocation22_spill]]  ;;  %s3863_s21 = smov %s3013_s22 }
 0x2b4   : > { %p21_p5 = scmp.ge.s32.totalorder %s3860_s24, 4   ;;  %s3864_s22 = smov %s3861_s7 }
 0x2b6   :  { %23 = sbr.rel (!%p21_p5) target bundleno = 12 (0xc), region = 112 }
 0x2bd   :  { %2184 = vsyncpa [#allocation3], 1 }
 0x2be   :  { %2186 = vsyncpa [#allocation3 + $0x1], 1 }
 0x2bf   :  { %2187 = vsyncpa [#allocation6], 1 }
 0x2c0   :  { %2188 = vsyncpa [#allocation10], 1 }
 0x2c1   :  { %2189 = vsyncpa [#allocation4], 1 }
 0x2c2   :  { %2191 = vsyncpa [#allocation4 + $0x1], 1 }

</bundles_post_ra>
